<compile_context>
chip_gen: v7x
topology: tpu7x:2x2x1
jax: 0.10.0
libtpu: 0.0.40
codegen_flags: <defaults>
</compile_context>

<pallas_src>
import numpy as np
import jax
import jax.numpy as jnp
from jax import lax
from jax.experimental import pallas as pl
from jax.experimental.pallas import tpu as pltpu


# ------------------------------ small helpers ------------------------------- #

def _round_up(v, m):
    return (v + m - 1) // m * m


def _mod_const(v, d):
    # Vector int mod by a compile-time constant; pow2 -> bitwise AND (always
    # supported on the VPU), otherwise fall back to %.
    if d & (d - 1) == 0:
        return jnp.bitwise_and(v, d - 1)
    return v % d


def _div_const(v, d):
    if d & (d - 1) == 0:
        return jnp.right_shift(v, int(d).bit_length() - 1)
    return v // d


def _use_batch_grid(n: int) -> bool:
    """Parallel batch grid only on multi-TensorCore chips (e.g. v7x)."""
    if n <= 1:
        return False
    try:
        kind = jax.devices()[0].device_kind.lower()
    except Exception:
        return False
    if any(t in kind for t in ("lite", "v5e", "v6e")):   # single-TC chips
        return False
    return any(t in kind for t in ("v3", "v4", "v5p", "v7"))


# ------------------------------ fused kernel -------------------------------- #

def _make_inception_kernel(H, W, o1, o2r_p, o5r_p):
    def kernel(x_ref, wf_ref, w2b_ref, w3b_ref, o_ref):
        cin_p, L = x_ref.shape                 # channels padded to 8, lane-dense
        o3 = w2b_ref.shape[1]
        o5 = w3b_ref.shape[1]
        mf = wf_ref.shape[0]
        ctot = o_ref.shape[0]
        dt = o_ref.dtype

        x = x_ref[...].astype(jnp.float32)     # (cin_p, L); row `Cin` is ones

        # In-kernel spatial coordinates (no row/col input DMAs).
        idx = lax.broadcasted_iota(jnp.int32, (1, L), 1)
        col = _mod_const(idx, W)
        row = _mod_const(_div_const(idx, W), H)

        # One boundary mask per unique (sy, sx); shared by maxpool / 3x3 / 5x5.
        mask_cache = {}

        def offset_mask(sy, sx):
            m = mask_cache.get((sy, sx))
            if m is None:
                conds = []
                if sy > 0:
                    conds.append(row < (H - sy))
                if sy < 0:
                    conds.append(row >= (-sy))
                if sx > 0:
                    conds.append(col < (W - sx))
                if sx < 0:
                    conds.append(col >= (-sx))
                m = conds[0]
                for c in conds[1:]:
                    m = m & c
                mask_cache[(sy, sx)] = m
            return m

        def shift2d(img, sy, sx, fill):
            # out[c, p] = img[c, p + sy*W + sx] within each HxW image, else fill.
            if sy == 0 and sx == 0:
                return img
            r = (-(sy * W + sx)) % L           # jnp.roll-style shift amount
            rolled = pltpu.roll(img, shift=r, axis=1)
            return jnp.where(offset_mask(sy, sx), rolled, fill)

        def maxpool3(img):
            acc = img                          # center tap always valid
            for sy in (-1, 0, 1):
                for sx in (-1, 0, 1):
                    if sy == 0 and sx == 0:
                        continue
                    acc = jnp.maximum(acc, shift2d(img, sy, sx, -jnp.inf))
            return acc

        def conv_relu_chunked(inp, w_ref, k):
            # Row-chunked im2col: one (cout, k*cin) @ (k*cin, L) MXU accumulate
            # per dy keeps <= k taps live (no vreg spills). Bias is pre-folded
            # into the center-tap column of the "ones" channel.
            pad = (k - 1) // 2
            cout = w_ref.shape[1]
            acc = jnp.zeros((cout, L), jnp.float32)
            for dy in range(k):
                taps = [shift2d(inp, dy - pad, dx - pad, 0.0) for dx in range(k)]
                patches = jnp.concatenate(taps, axis=0)          # (k*cin_p, L)
                acc = acc + jnp.dot(w_ref[dy], patches,
                                    preferred_element_type=jnp.float32)
            return jnp.maximum(acc, 0.0)

        # ---- Stage 1: maxpool + ALL four 1x1 convs in one fused matmul ----
        pooled = maxpool3(x)                                     # (cin_p, L)
        stacked = jnp.concatenate([x, pooled], axis=0)           # (2*cin_p, L)
        z = jnp.dot(wf_ref[...], stacked, preferred_element_type=jnp.float32)
        z = jnp.maximum(z, 0.0)                # biases folded via ones channel

        y1 = z[0:o1]
        y2a = z[o1:o1 + o2r_p]
        y3a = z[o1 + o2r_p:o1 + o2r_p + o5r_p]
        y4 = z[o1 + o2r_p + o5r_p:mf]

        # Finished branches stored immediately (shorter live ranges), directly
        # into their output row slices -- no concat intermediate.
        o_ref[0:o1, :] = y1.astype(dt)
        o_ref[o1 + o3 + o5:ctot, :] = y4.astype(dt)

        # ---- Stage 2: 3x3 / 5x5 convs on the reduced activations ----
        o_ref[o1:o1 + o3, :] = conv_relu_chunked(y2a, w2b_ref, 3).astype(dt)
        o_ref[o1 + o3:o1 + o3 + o5, :] = conv_relu_chunked(y3a, w3b_ref, 5).astype(dt)

    return kernel


# ---------------------------- weight packing --------------------------------- #

def _pack_fused_1x1(w1, b1, w2a, b2a, w3a, b3a, w4, b4, Cin, Cin_p, o2r_p, o5r_p):
    # Block-diagonal weight for [branch1 | branch2-reduce | branch3-reduce |
    # pool-branch] acting on concat([x_padded, maxpool(x)_padded]).
    # Column `Cin` of x (and `Cin_p+Cin` of pooled) is the "ones" channel:
    # biases live there. The first padded output row of each reduce block is
    # turned into a ones channel (bias entry 1.0) so downstream 3x3/5x5 biases
    # can be folded the same way.
    o1, o2r, o5r, opool = w1.shape[0], w2a.shape[0], w3a.shape[0], w4.shape[0]
    Mf, Kf = o1 + o2r_p + o5r_p + opool, 2 * Cin_p
    Wf = jnp.zeros((Mf, Kf), jnp.float32)
    r = 0
    Wf = Wf.at[r:r + o1, 0:Cin].set(w1.reshape(o1, Cin).astype(jnp.float32))
    Wf = Wf.at[r:r + o1, Cin].set(b1)
    r += o1
    Wf = Wf.at[r:r + o2r, 0:Cin].set(w2a.reshape(o2r, Cin).astype(jnp.float32))
    Wf = Wf.at[r:r + o2r, Cin].set(b2a)
    Wf = Wf.at[r + o2r, Cin].set(1.0)          # ones channel for folding b2b
    r += o2r_p
    Wf = Wf.at[r:r + o5r, 0:Cin].set(w3a.reshape(o5r, Cin).astype(jnp.float32))
    Wf = Wf.at[r:r + o5r, Cin].set(b3a)
    Wf = Wf.at[r + o5r, Cin].set(1.0)          # ones channel for folding b3b
    r += o5r_p
    Wf = Wf.at[r:r + opool, Cin_p:Cin_p + Cin].set(
        w4.reshape(opool, Cin).astype(jnp.float32))
    Wf = Wf.at[r:r + opool, Cin_p + Cin].set(b4)
    return Wf


def _pack_kxk(w, b, cin_p, k):
    # OIHW (cout, cin, k, k) -> (k, cout, k*cin_p) row chunks; rows within a
    # chunk ordered (dx, ci) with ci padded to cin_p. Bias folded at the
    # center tap's "ones" input channel (index cin).
    cout, cin = w.shape[0], w.shape[1]
    out = jnp.zeros((k, cout, k * cin_p), jnp.float32)
    for dy in range(k):
        for dx in range(k):
            out = out.at[dy, :, dx * cin_p:dx * cin_p + cin].set(
                w[:, :, dy, dx].astype(jnp.float32))
    c = (k - 1) // 2
    out = out.at[c, :, c * cin_p + cin].set(b)
    return out


# --------------------------------- wrapper ----------------------------------- #

def inception_block(params, x_nchw, batch_grid=None):
    N, Cin, H, W = x_nchw.shape
    HW = H * W
    if batch_grid is None:
        batch_grid = _use_batch_grid(N)

    w1, b1 = params["b1"]
    w2a, b2a = params["b2a"]
    w2b, b2b = params["b2b"]
    w3a, b3a = params["b3a"]
    w3b, b3b = params["b3b"]
    w4, b4 = params["b4"]

    o1, o3, o5, opool = w1.shape[0], w2b.shape[0], w3b.shape[0], w4.shape[0]
    o2r, o5r = w2a.shape[0], w3a.shape[0]
    Ctot = o1 + o3 + o5 + opool

    # Sublane-friendly channel padding (+1 slot reserved for the ones channel).
    Cin_p = _round_up(Cin + 1, 8)
    o2r_p = _round_up(o2r + 1, 8)
    o5r_p = _round_up(o5r + 1, 8)

    # Activations: lane-dense (channels on sublanes, flattened spatial on lanes).
    if batch_grid:                     # one image per grid step (multi-TC chips)
        G, L = N, HW
        xg = x_nchw.reshape(N, Cin, HW)
    else:                              # fold batch into lanes: single grid step
        G, L = 1, N * HW
        xg = jnp.transpose(x_nchw, (1, 0, 2, 3)).reshape(1, Cin, N * HW)
    parts = [xg.astype(jnp.float32), jnp.ones((G, 1, L), jnp.float32)]
    if Cin_p - Cin - 1 > 0:
        parts.append(jnp.zeros((G, Cin_p - Cin - 1, L), jnp.float32))
    xg = jnp.concatenate(parts, axis=1)                       # (G, Cin_p, L)

    # Weights: 3 packed slabs, all 7 biases folded in.
    Wf = _pack_fused_1x1(w1, b1, w2a, b2a, w3a, b3a, w4, b4,
                         Cin, Cin_p, o2r_p, o5r_p)            # (Mf, 2*Cin_p)
    W2b = _pack_kxk(w2b, b2b, o2r_p, 3)                       # (3, o3, 3*o2r_p)
    W3b = _pack_kxk(w3b, b3b, o5r_p, 5)                       # (5, o5, 5*o5r_p)

    out = pl.pallas_call(
        _make_inception_kernel(H, W, o1, o2r_p, o5r_p),
        out_shape=jax.ShapeDtypeStruct((G, Ctot, L), x_nchw.dtype),
        grid=(G,),
        in_specs=[
            pl.BlockSpec((None, Cin_p, L), lambda n: (n, 0, 0)),
            pl.BlockSpec(Wf.shape, lambda n: (0, 0)),
            pl.BlockSpec(W2b.shape, lambda n: (0, 0, 0)),
            pl.BlockSpec(W3b.shape, lambda n: (0, 0, 0)),
        ],
        out_specs=pl.BlockSpec((None, Ctot, L), lambda n: (n, 0, 0)),
        compiler_params=pltpu.CompilerParams(
            dimension_semantics=("parallel",)),
    )(xg, Wf, W2b, W3b)

    if batch_grid:
        return out.reshape(N, Ctot, H, W)
    return jnp.transpose(out.reshape(Ctot, N, H, W), (1, 0, 2, 3))


# --------------------------- parameter setup --------------------------------- #

def init_conv(key, cin, cout, k):
    kw, kb = jax.random.split(key)
    bound = 1.0 / np.sqrt(cin * k * k)
    w = jax.random.uniform(kw, (cout, cin, k, k), jnp.float32, -bound, bound)
    b = jax.random.uniform(kb, (cout,), jnp.float32, -bound, bound)
    return w, b


def init_inception_params(key, in_ch, o1, o2r, o3, o5r, o5, opool):
    ks = jax.random.split(key, 6)
    return {
        "b1":  init_conv(ks[0], in_ch, o1, 1),
        "b2a": init_conv(ks[1], in_ch, o2r, 1),
        "b2b": init_conv(ks[2], o2r, o3, 3),
        "b3a": init_conv(ks[3], in_ch, o5r, 1),
        "b3b": init_conv(ks[4], o5r, o5, 5),
        "b4":  init_conv(ks[5], in_ch, opool, 1),
    }


# --------------------------- pure-JAX reference ------------------------------ #

def _conv_relu_ref(x, w, b, p):
    y = lax.conv_general_dilated(
        x, w, (1, 1), [(p, p), (p, p)],
        dimension_numbers=("NCHW", "OIHW", "NCHW"),
        precision=lax.Precision.HIGHEST)
    return jnp.maximum(y + b[None, :, None, None], 0.0)


def _maxpool_ref(x):
    return lax.reduce_window(x, -jnp.inf, lax.max, (1, 1, 3, 3), (1, 1, 1, 1),
                             [(0, 0), (0, 0), (1, 1), (1, 1)])


def inception_ref(params, x):
    w, b = params["b1"];  y1 = _conv_relu_ref(x, w, b, 0)
    w, b = params["b2a"]; t = _conv_relu_ref(x, w, b, 0)
    w, b = params["b2b"]; y2 = _conv_relu_ref(t, w, b, 1)
    w, b = params["b3a"]; t = _conv_relu_ref(x, w, b, 0)
    w, b = params["b3b"]; y3 = _conv_relu_ref(t, w, b, 2)
    t = _maxpool_ref(x)
    w, b = params["b4"];  y4 = _conv_relu_ref(t, w, b, 0)
    return jnp.concatenate([y1, y2, y3, y4], axis=1)


# ----------------------------------- main ------------------------------------ #

if __name__ == "__main__":
    key = jax.random.PRNGKey(0)
    k_x, k_p = jax.random.split(key)

    # Inception_Block(in_channels=4, output_1x1=8, output_1x1_block2=4,
    #                 output_3x3=8, output_5x5_reduce=4, output_5x5=8,
    #                 output_pool=8)
    in_ch, o1, o2r, o3, o5r, o5, opool = 4, 8, 4, 8, 4, 8, 8
    N, H, W = 2, 16, 16

    x = jax.random.normal(k_x, (N, in_ch, H, W), jnp.float32)   # NCHW input
    params = init_inception_params(k_p, in_ch, o1, o2r, o3, o5r, o5, opool)

    out = jax.jit(inception_block)(params, x)
    out = jax.block_until_ready(out)
    assert out.shape == (N, o1 + o3 + o5 + opool, H, W), out.shape

    ref = jax.block_until_ready(inception_ref(params, x))
    np.testing.assert_allclose(np.asarray(out), np.asarray(ref),
                               rtol=1e-3, atol=1e-3)

    print("KERNEL_OK")
</pallas_src>

<mosaic_0001>
module attributes {stable_mosaic.version = 11 : i64} {
  func.func @kernel(%arg0: i32, %arg1: memref<1x8x512xf32, #tpu.memory_space<vmem>>, %arg2: memref<32x16xf32, #tpu.memory_space<vmem>>, %arg3: memref<3x8x24xf32, #tpu.memory_space<vmem>>, %arg4: memref<5x8x40xf32, #tpu.memory_space<vmem>>, %arg5: memref<1x32x512xf32, #tpu.memory_space<vmem>>) attributes {dimension_semantics = [#tpu.dimension_semantics<parallel>], iteration_bounds = array<i64: 1>, scalar_prefetch = 0 : i64, scratch_operands = 0 : i64, tpu.core_type = #tpu.core_type<tc>, window_params = [{transform_indices = @transform_0, window_bounds = array<i64: 1, 8, 512>}, {pipeline_mode = #tpu.pipeline_mode<synchronous>, transform_indices = @transform_1, window_bounds = array<i64: 32, 16>}, {pipeline_mode = #tpu.pipeline_mode<synchronous>, transform_indices = @transform_2, window_bounds = array<i64: 3, 8, 24>}, {pipeline_mode = #tpu.pipeline_mode<synchronous>, transform_indices = @transform_3, window_bounds = array<i64: 5, 8, 40>}, {transform_indices = @transform_4, window_bounds = array<i64: 1, 32, 512>}]} {
    %c0 = arith.constant 0 : index
    %c0_0 = arith.constant 0 : index
    %c0_1 = arith.constant 0 : index
    %0 = vector.load %arg1[%c0, %c0_0, %c0_1] : memref<1x8x512xf32, #tpu.memory_space<vmem>>, vector<1x8x512xf32>
    %1 = vector.shape_cast %0 : vector<1x8x512xf32> to vector<8x512xf32>
    %2 = tpu.iota {dimensions = array<i32: 1>} : vector<1x512xi32>
    %c15_i32 = arith.constant 15 : i32
    %3 = vector.broadcast %c15_i32 : i32 to vector<1x512xi32>
    %4 = arith.andi %2, %3 : vector<1x512xi32>
    %c4_i32 = arith.constant 4 : i32
    %5 = vector.broadcast %c4_i32 : i32 to vector<1x512xi32>
    %6 = arith.shrsi %2, %5 : vector<1x512xi32>
    %c15_i32_2 = arith.constant 15 : i32
    %7 = vector.broadcast %c15_i32_2 : i32 to vector<1x512xi32>
    %8 = arith.andi %6, %7 : vector<1x512xi32>
    %c17_i32 = arith.constant 17 : i32
    %9 = tpu.dynamic_rotate %1 by %c17_i32 dim 1 : vector<8x512xf32>, i32 -> vector<8x512xf32>
    %c1_i32 = arith.constant 1 : i32
    %10 = vector.broadcast %c1_i32 : i32 to vector<1x512xi32>
    %11 = arith.cmpi sge, %8, %10 : vector<1x512xi32>
    %c1_i32_3 = arith.constant 1 : i32
    %12 = vector.broadcast %c1_i32_3 : i32 to vector<1x512xi32>
    %13 = arith.cmpi sge, %4, %12 : vector<1x512xi32>
    %14 = arith.andi %11, %13 : vector<1x512xi1>
    %cst = arith.constant 0xFF800000 : f32
    %15 = vector.shape_cast %14 : vector<1x512xi1> to vector<1x512xi1>
    %16 = vector.broadcast %15 : vector<1x512xi1> to vector<8x512xi1>
    %17 = vector.broadcast %cst : f32 to vector<8x512xf32>
    %18 = arith.select %16, %9, %17 : vector<8x512xi1>, vector<8x512xf32>
    %19 = arith.maximumf %1, %18 : vector<8x512xf32>
    %c16_i32 = arith.constant 16 : i32
    %20 = tpu.dynamic_rotate %1 by %c16_i32 dim 1 : vector<8x512xf32>, i32 -> vector<8x512xf32>
    %c1_i32_4 = arith.constant 1 : i32
    %21 = vector.broadcast %c1_i32_4 : i32 to vector<1x512xi32>
    %22 = arith.cmpi sge, %8, %21 : vector<1x512xi32>
    %cst_5 = arith.constant 0xFF800000 : f32
    %23 = vector.shape_cast %22 : vector<1x512xi1> to vector<1x512xi1>
    %24 = vector.broadcast %23 : vector<1x512xi1> to vector<8x512xi1>
    %25 = vector.broadcast %cst_5 : f32 to vector<8x512xf32>
    %26 = arith.select %24, %20, %25 : vector<8x512xi1>, vector<8x512xf32>
    %27 = arith.maximumf %19, %26 : vector<8x512xf32>
    %c15_i32_6 = arith.constant 15 : i32
    %28 = tpu.dynamic_rotate %1 by %c15_i32_6 dim 1 : vector<8x512xf32>, i32 -> vector<8x512xf32>
    %c1_i32_7 = arith.constant 1 : i32
    %29 = vector.broadcast %c1_i32_7 : i32 to vector<1x512xi32>
    %30 = arith.cmpi sge, %8, %29 : vector<1x512xi32>
    %c15_i32_8 = arith.constant 15 : i32
    %31 = vector.broadcast %c15_i32_8 : i32 to vector<1x512xi32>
    %32 = arith.cmpi slt, %4, %31 : vector<1x512xi32>
    %33 = arith.andi %30, %32 : vector<1x512xi1>
    %cst_9 = arith.constant 0xFF800000 : f32
    %34 = vector.shape_cast %33 : vector<1x512xi1> to vector<1x512xi1>
    %35 = vector.broadcast %34 : vector<1x512xi1> to vector<8x512xi1>
    %36 = vector.broadcast %cst_9 : f32 to vector<8x512xf32>
    %37 = arith.select %35, %28, %36 : vector<8x512xi1>, vector<8x512xf32>
    %38 = arith.maximumf %27, %37 : vector<8x512xf32>
    %c1_i32_10 = arith.constant 1 : i32
    %39 = tpu.dynamic_rotate %1 by %c1_i32_10 dim 1 : vector<8x512xf32>, i32 -> vector<8x512xf32>
    %c1_i32_11 = arith.constant 1 : i32
    %40 = vector.broadcast %c1_i32_11 : i32 to vector<1x512xi32>
    %41 = arith.cmpi sge, %4, %40 : vector<1x512xi32>
    %cst_12 = arith.constant 0xFF800000 : f32
    %42 = vector.shape_cast %41 : vector<1x512xi1> to vector<1x512xi1>
    %43 = vector.broadcast %42 : vector<1x512xi1> to vector<8x512xi1>
    %44 = vector.broadcast %cst_12 : f32 to vector<8x512xf32>
    %45 = arith.select %43, %39, %44 : vector<8x512xi1>, vector<8x512xf32>
    %46 = arith.maximumf %38, %45 : vector<8x512xf32>
    %c511_i32 = arith.constant 511 : i32
    %47 = tpu.dynamic_rotate %1 by %c511_i32 dim 1 : vector<8x512xf32>, i32 -> vector<8x512xf32>
    %c15_i32_13 = arith.constant 15 : i32
    %48 = vector.broadcast %c15_i32_13 : i32 to vector<1x512xi32>
    %49 = arith.cmpi slt, %4, %48 : vector<1x512xi32>
    %cst_14 = arith.constant 0xFF800000 : f32
    %50 = vector.shape_cast %49 : vector<1x512xi1> to vector<1x512xi1>
    %51 = vector.broadcast %50 : vector<1x512xi1> to vector<8x512xi1>
    %52 = vector.broadcast %cst_14 : f32 to vector<8x512xf32>
    %53 = arith.select %51, %47, %52 : vector<8x512xi1>, vector<8x512xf32>
    %54 = arith.maximumf %46, %53 : vector<8x512xf32>
    %c497_i32 = arith.constant 497 : i32
    %55 = tpu.dynamic_rotate %1 by %c497_i32 dim 1 : vector<8x512xf32>, i32 -> vector<8x512xf32>
    %c15_i32_15 = arith.constant 15 : i32
    %56 = vector.broadcast %c15_i32_15 : i32 to vector<1x512xi32>
    %57 = arith.cmpi slt, %8, %56 : vector<1x512xi32>
    %c1_i32_16 = arith.constant 1 : i32
    %58 = vector.broadcast %c1_i32_16 : i32 to vector<1x512xi32>
    %59 = arith.cmpi sge, %4, %58 : vector<1x512xi32>
    %60 = arith.andi %57, %59 : vector<1x512xi1>
    %cst_17 = arith.constant 0xFF800000 : f32
    %61 = vector.shape_cast %60 : vector<1x512xi1> to vector<1x512xi1>
    %62 = vector.broadcast %61 : vector<1x512xi1> to vector<8x512xi1>
    %63 = vector.broadcast %cst_17 : f32 to vector<8x512xf32>
    %64 = arith.select %62, %55, %63 : vector<8x512xi1>, vector<8x512xf32>
    %65 = arith.maximumf %54, %64 : vector<8x512xf32>
    %c496_i32 = arith.constant 496 : i32
    %66 = tpu.dynamic_rotate %1 by %c496_i32 dim 1 : vector<8x512xf32>, i32 -> vector<8x512xf32>
    %c15_i32_18 = arith.constant 15 : i32
    %67 = vector.broadcast %c15_i32_18 : i32 to vector<1x512xi32>
    %68 = arith.cmpi slt, %8, %67 : vector<1x512xi32>
    %cst_19 = arith.constant 0xFF800000 : f32
    %69 = vector.shape_cast %68 : vector<1x512xi1> to vector<1x512xi1>
    %70 = vector.broadcast %69 : vector<1x512xi1> to vector<8x512xi1>
    %71 = vector.broadcast %cst_19 : f32 to vector<8x512xf32>
    %72 = arith.select %70, %66, %71 : vector<8x512xi1>, vector<8x512xf32>
    %73 = arith.maximumf %65, %72 : vector<8x512xf32>
    %c495_i32 = arith.constant 495 : i32
    %74 = tpu.dynamic_rotate %1 by %c495_i32 dim 1 : vector<8x512xf32>, i32 -> vector<8x512xf32>
    %c15_i32_20 = arith.constant 15 : i32
    %75 = vector.broadcast %c15_i32_20 : i32 to vector<1x512xi32>
    %76 = arith.cmpi slt, %8, %75 : vector<1x512xi32>
    %c15_i32_21 = arith.constant 15 : i32
    %77 = vector.broadcast %c15_i32_21 : i32 to vector<1x512xi32>
    %78 = arith.cmpi slt, %4, %77 : vector<1x512xi32>
    %79 = arith.andi %76, %78 : vector<1x512xi1>
    %cst_22 = arith.constant 0xFF800000 : f32
    %80 = vector.shape_cast %79 : vector<1x512xi1> to vector<1x512xi1>
    %81 = vector.broadcast %80 : vector<1x512xi1> to vector<8x512xi1>
    %82 = vector.broadcast %cst_22 : f32 to vector<8x512xf32>
    %83 = arith.select %81, %74, %82 : vector<8x512xi1>, vector<8x512xf32>
    %84 = arith.maximumf %73, %83 : vector<8x512xf32>
    %85 = tpu.concatenate %1, %84 in 0 : vector<8x512xf32>, vector<8x512xf32> -> vector<16x512xf32>
    %c0_23 = arith.constant 0 : index
    %c0_24 = arith.constant 0 : index
    %86 = vector.load %arg2[%c0_23, %c0_24] : memref<32x16xf32, #tpu.memory_space<vmem>>, vector<32x16xf32>
    %cst_25 = arith.constant dense<0.000000e+00> : vector<32x512xf32>
    %87 = tpu.matmul %86, %85, %cst_25 {dimension_numbers = #tpu.dot_dimension_numbers<[1], [0], [0], [1], [0, 0, 1, 1], [], []>} : vector<32x16xf32>, vector<16x512xf32>, vector<32x512xf32> -> vector<32x512xf32>
    %cst_26 = arith.constant 0.000000e+00 : f32
    %88 = vector.broadcast %cst_26 : f32 to vector<32x512xf32>
    %89 = arith.maximumf %87, %88 : vector<32x512xf32>
    %90 = vector.extract_strided_slice %89 {offsets = [0, 0], sizes = [8, 512], strides = [1, 1]} : vector<32x512xf32> to vector<8x512xf32>
    %91 = vector.extract_strided_slice %89 {offsets = [8, 0], sizes = [8, 512], strides = [1, 1]} : vector<32x512xf32> to vector<8x512xf32>
    %92 = vector.extract_strided_slice %89 {offsets = [16, 0], sizes = [8, 512], strides = [1, 1]} : vector<32x512xf32> to vector<8x512xf32>
    %93 = vector.extract_strided_slice %89 {offsets = [24, 0], sizes = [8, 512], strides = [1, 1]} : vector<32x512xf32> to vector<8x512xf32>
    %c0_27 = arith.constant 0 : index
    %c0_28 = arith.constant 0 : index
    %c0_29 = arith.constant 0 : index
    %94 = vector.load %arg5[%c0_27, %c0_28, %c0_29] : memref<1x32x512xf32, #tpu.memory_space<vmem>>, vector<1x8x512xf32>
    %95 = vector.shape_cast %94 : vector<1x8x512xf32> to vector<8x512xf32>
    %96 = vector.shape_cast %90 : vector<8x512xf32> to vector<1x8x512xf32>
    tpu.vector_store %arg5[%c0_27, %c0_28, %c0_29], %96 {strides = array<i32>} : memref<1x32x512xf32, #tpu.memory_space<vmem>>, vector<1x8x512xf32>,
    %c0_30 = arith.constant 0 : index
    %c24 = arith.constant 24 : index
    %c0_31 = arith.constant 0 : index
    %97 = vector.load %arg5[%c0_30, %c24, %c0_31] : memref<1x32x512xf32, #tpu.memory_space<vmem>>, vector<1x8x512xf32>
    %98 = vector.shape_cast %97 : vector<1x8x512xf32> to vector<8x512xf32>
    %99 = vector.shape_cast %93 : vector<8x512xf32> to vector<1x8x512xf32>
    tpu.vector_store %arg5[%c0_30, %c24, %c0_31], %99 {strides = array<i32>} : memref<1x32x512xf32, #tpu.memory_space<vmem>>, vector<1x8x512xf32>,
    %cst_32 = arith.constant 0.000000e+00 : f32
    %100 = vector.broadcast %cst_32 : f32 to vector<8x512xf32>
    %c17_i32_33 = arith.constant 17 : i32
    %101 = tpu.dynamic_rotate %91 by %c17_i32_33 dim 1 : vector<8x512xf32>, i32 -> vector<8x512xf32>
    %cst_34 = arith.constant 0.000000e+00 : f32
    %102 = vector.shape_cast %14 : vector<1x512xi1> to vector<1x512xi1>
    %103 = vector.broadcast %102 : vector<1x512xi1> to vector<8x512xi1>
    %104 = vector.broadcast %cst_34 : f32 to vector<8x512xf32>
    %105 = arith.select %103, %101, %104 : vector<8x512xi1>, vector<8x512xf32>
    %c16_i32_35 = arith.constant 16 : i32
    %106 = tpu.dynamic_rotate %91 by %c16_i32_35 dim 1 : vector<8x512xf32>, i32 -> vector<8x512xf32>
    %cst_36 = arith.constant 0.000000e+00 : f32
    %107 = vector.shape_cast %22 : vector<1x512xi1> to vector<1x512xi1>
    %108 = vector.broadcast %107 : vector<1x512xi1> to vector<8x512xi1>
    %109 = vector.broadcast %cst_36 : f32 to vector<8x512xf32>
    %110 = arith.select %108, %106, %109 : vector<8x512xi1>, vector<8x512xf32>
    %c15_i32_37 = arith.constant 15 : i32
    %111 = tpu.dynamic_rotate %91 by %c15_i32_37 dim 1 : vector<8x512xf32>, i32 -> vector<8x512xf32>
    %cst_38 = arith.constant 0.000000e+00 : f32
    %112 = vector.shape_cast %33 : vector<1x512xi1> to vector<1x512xi1>
    %113 = vector.broadcast %112 : vector<1x512xi1> to vector<8x512xi1>
    %114 = vector.broadcast %cst_38 : f32 to vector<8x512xf32>
    %115 = arith.select %113, %111, %114 : vector<8x512xi1>, vector<8x512xf32>
    %116 = tpu.concatenate %105, %110, %115 in 0 : vector<8x512xf32>, vector<8x512xf32>, vector<8x512xf32> -> vector<24x512xf32>
    %c0_39 = arith.constant 0 : index
    %c0_40 = arith.constant 0 : index
    %c0_41 = arith.constant 0 : index
    %117 = vector.load %arg3[%c0_39, %c0_40, %c0_41] : memref<3x8x24xf32, #tpu.memory_space<vmem>>, vector<1x8x24xf32>
    %118 = vector.shape_cast %117 : vector<1x8x24xf32> to vector<8x24xf32>
    %cst_42 = arith.constant dense<0.000000e+00> : vector<8x512xf32>
    %119 = tpu.matmul %118, %116, %cst_42 {dimension_numbers = #tpu.dot_dimension_numbers<[1], [0], [0], [1], [0, 0, 1, 1], [], []>} : vector<8x24xf32>, vector<24x512xf32>, vector<8x512xf32> -> vector<8x512xf32>
    %120 = arith.addf %100, %119 : vector<8x512xf32>
    %c1_i32_43 = arith.constant 1 : i32
    %121 = tpu.dynamic_rotate %91 by %c1_i32_43 dim 1 : vector<8x512xf32>, i32 -> vector<8x512xf32>
    %cst_44 = arith.constant 0.000000e+00 : f32
    %122 = vector.shape_cast %41 : vector<1x512xi1> to vector<1x512xi1>
    %123 = vector.broadcast %122 : vector<1x512xi1> to vector<8x512xi1>
    %124 = vector.broadcast %cst_44 : f32 to vector<8x512xf32>
    %125 = arith.select %123, %121, %124 : vector<8x512xi1>, vector<8x512xf32>
    %c511_i32_45 = arith.constant 511 : i32
    %126 = tpu.dynamic_rotate %91 by %c511_i32_45 dim 1 : vector<8x512xf32>, i32 -> vector<8x512xf32>
    %cst_46 = arith.constant 0.000000e+00 : f32
    %127 = vector.shape_cast %49 : vector<1x512xi1> to vector<1x512xi1>
    %128 = vector.broadcast %127 : vector<1x512xi1> to vector<8x512xi1>
    %129 = vector.broadcast %cst_46 : f32 to vector<8x512xf32>
    %130 = arith.select %128, %126, %129 : vector<8x512xi1>, vector<8x512xf32>
    %131 = tpu.concatenate %125, %91, %130 in 0 : vector<8x512xf32>, vector<8x512xf32>, vector<8x512xf32> -> vector<24x512xf32>
    %c1 = arith.constant 1 : index
    %c0_47 = arith.constant 0 : index
    %c0_48 = arith.constant 0 : index
    %132 = vector.load %arg3[%c1, %c0_47, %c0_48] : memref<3x8x24xf32, #tpu.memory_space<vmem>>, vector<1x8x24xf32>
    %133 = vector.shape_cast %132 : vector<1x8x24xf32> to vector<8x24xf32>
    %cst_49 = arith.constant dense<0.000000e+00> : vector<8x512xf32>
    %134 = tpu.matmul %133, %131, %cst_49 {dimension_numbers = #tpu.dot_dimension_numbers<[1], [0], [0], [1], [0, 0, 1, 1], [], []>} : vector<8x24xf32>, vector<24x512xf32>, vector<8x512xf32> -> vector<8x512xf32>
    %135 = arith.addf %120, %134 : vector<8x512xf32>
    %c497_i32_50 = arith.constant 497 : i32
    %136 = tpu.dynamic_rotate %91 by %c497_i32_50 dim 1 : vector<8x512xf32>, i32 -> vector<8x512xf32>
    %cst_51 = arith.constant 0.000000e+00 : f32
    %137 = vector.shape_cast %60 : vector<1x512xi1> to vector<1x512xi1>
    %138 = vector.broadcast %137 : vector<1x512xi1> to vector<8x512xi1>
    %139 = vector.broadcast %cst_51 : f32 to vector<8x512xf32>
    %140 = arith.select %138, %136, %139 : vector<8x512xi1>, vector<8x512xf32>
    %c496_i32_52 = arith.constant 496 : i32
    %141 = tpu.dynamic_rotate %91 by %c496_i32_52 dim 1 : vector<8x512xf32>, i32 -> vector<8x512xf32>
    %cst_53 = arith.constant 0.000000e+00 : f32
    %142 = vector.shape_cast %68 : vector<1x512xi1> to vector<1x512xi1>
    %143 = vector.broadcast %142 : vector<1x512xi1> to vector<8x512xi1>
    %144 = vector.broadcast %cst_53 : f32 to vector<8x512xf32>
    %145 = arith.select %143, %141, %144 : vector<8x512xi1>, vector<8x512xf32>
    %c495_i32_54 = arith.constant 495 : i32
    %146 = tpu.dynamic_rotate %91 by %c495_i32_54 dim 1 : vector<8x512xf32>, i32 -> vector<8x512xf32>
    %cst_55 = arith.constant 0.000000e+00 : f32
    %147 = vector.shape_cast %79 : vector<1x512xi1> to vector<1x512xi1>
    %148 = vector.broadcast %147 : vector<1x512xi1> to vector<8x512xi1>
    %149 = vector.broadcast %cst_55 : f32 to vector<8x512xf32>
    %150 = arith.select %148, %146, %149 : vector<8x512xi1>, vector<8x512xf32>
    %151 = tpu.concatenate %140, %145, %150 in 0 : vector<8x512xf32>, vector<8x512xf32>, vector<8x512xf32> -> vector<24x512xf32>
    %c2 = arith.constant 2 : index
    %c0_56 = arith.constant 0 : index
    %c0_57 = arith.constant 0 : index
    %152 = vector.load %arg3[%c2, %c0_56, %c0_57] : memref<3x8x24xf32, #tpu.memory_space<vmem>>, vector<1x8x24xf32>
    %153 = vector.shape_cast %152 : vector<1x8x24xf32> to vector<8x24xf32>
    %cst_58 = arith.constant dense<0.000000e+00> : vector<8x512xf32>
    %154 = tpu.matmul %153, %151, %cst_58 {dimension_numbers = #tpu.dot_dimension_numbers<[1], [0], [0], [1], [0, 0, 1, 1], [], []>} : vector<8x24xf32>, vector<24x512xf32>, vector<8x512xf32> -> vector<8x512xf32>
    %155 = arith.addf %135, %154 : vector<8x512xf32>
    %cst_59 = arith.constant 0.000000e+00 : f32
    %156 = vector.broadcast %cst_59 : f32 to vector<8x512xf32>
    %157 = arith.maximumf %155, %156 : vector<8x512xf32>
    %c0_60 = arith.constant 0 : index
    %c8 = arith.constant 8 : index
    %c0_61 = arith.constant 0 : index
    %158 = vector.load %arg5[%c0_60, %c8, %c0_61] : memref<1x32x512xf32, #tpu.memory_space<vmem>>, vector<1x8x512xf32>
    %159 = vector.shape_cast %158 : vector<1x8x512xf32> to vector<8x512xf32>
    %160 = vector.shape_cast %157 : vector<8x512xf32> to vector<1x8x512xf32>
    tpu.vector_store %arg5[%c0_60, %c8, %c0_61], %160 {strides = array<i32>} : memref<1x32x512xf32, #tpu.memory_space<vmem>>, vector<1x8x512xf32>,
    %cst_62 = arith.constant 0.000000e+00 : f32
    %161 = vector.broadcast %cst_62 : f32 to vector<8x512xf32>
    %c34_i32 = arith.constant 34 : i32
    %162 = tpu.dynamic_rotate %92 by %c34_i32 dim 1 : vector<8x512xf32>, i32 -> vector<8x512xf32>
    %c2_i32 = arith.constant 2 : i32
    %163 = vector.broadcast %c2_i32 : i32 to vector<1x512xi32>
    %164 = arith.cmpi sge, %8, %163 : vector<1x512xi32>
    %c2_i32_63 = arith.constant 2 : i32
    %165 = vector.broadcast %c2_i32_63 : i32 to vector<1x512xi32>
    %166 = arith.cmpi sge, %4, %165 : vector<1x512xi32>
    %167 = arith.andi %164, %166 : vector<1x512xi1>
    %cst_64 = arith.constant 0.000000e+00 : f32
    %168 = vector.shape_cast %167 : vector<1x512xi1> to vector<1x512xi1>
    %169 = vector.broadcast %168 : vector<1x512xi1> to vector<8x512xi1>
    %170 = vector.broadcast %cst_64 : f32 to vector<8x512xf32>
    %171 = arith.select %169, %162, %170 : vector<8x512xi1>, vector<8x512xf32>
    %c33_i32 = arith.constant 33 : i32
    %172 = tpu.dynamic_rotate %92 by %c33_i32 dim 1 : vector<8x512xf32>, i32 -> vector<8x512xf32>
    %c2_i32_65 = arith.constant 2 : i32
    %173 = vector.broadcast %c2_i32_65 : i32 to vector<1x512xi32>
    %174 = arith.cmpi sge, %8, %173 : vector<1x512xi32>
    %c1_i32_66 = arith.constant 1 : i32
    %175 = vector.broadcast %c1_i32_66 : i32 to vector<1x512xi32>
    %176 = arith.cmpi sge, %4, %175 : vector<1x512xi32>
    %177 = arith.andi %174, %176 : vector<1x512xi1>
    %cst_67 = arith.constant 0.000000e+00 : f32
    %178 = vector.shape_cast %177 : vector<1x512xi1> to vector<1x512xi1>
    %179 = vector.broadcast %178 : vector<1x512xi1> to vector<8x512xi1>
    %180 = vector.broadcast %cst_67 : f32 to vector<8x512xf32>
    %181 = arith.select %179, %172, %180 : vector<8x512xi1>, vector<8x512xf32>
    %c32_i32 = arith.constant 32 : i32
    %182 = tpu.dynamic_rotate %92 by %c32_i32 dim 1 : vector<8x512xf32>, i32 -> vector<8x512xf32>
    %c2_i32_68 = arith.constant 2 : i32
    %183 = vector.broadcast %c2_i32_68 : i32 to vector<1x512xi32>
    %184 = arith.cmpi sge, %8, %183 : vector<1x512xi32>
    %cst_69 = arith.constant 0.000000e+00 : f32
    %185 = vector.shape_cast %184 : vector<1x512xi1> to vector<1x512xi1>
    %186 = vector.broadcast %185 : vector<1x512xi1> to vector<8x512xi1>
    %187 = vector.broadcast %cst_69 : f32 to vector<8x512xf32>
    %188 = arith.select %186, %182, %187 : vector<8x512xi1>, vector<8x512xf32>
    %c31_i32 = arith.constant 31 : i32
    %189 = tpu.dynamic_rotate %92 by %c31_i32 dim 1 : vector<8x512xf32>, i32 -> vector<8x512xf32>
    %c2_i32_70 = arith.constant 2 : i32
    %190 = vector.broadcast %c2_i32_70 : i32 to vector<1x512xi32>
    %191 = arith.cmpi sge, %8, %190 : vector<1x512xi32>
    %c15_i32_71 = arith.constant 15 : i32
    %192 = vector.broadcast %c15_i32_71 : i32 to vector<1x512xi32>
    %193 = arith.cmpi slt, %4, %192 : vector<1x512xi32>
    %194 = arith.andi %191, %193 : vector<1x512xi1>
    %cst_72 = arith.constant 0.000000e+00 : f32
    %195 = vector.shape_cast %194 : vector<1x512xi1> to vector<1x512xi1>
    %196 = vector.broadcast %195 : vector<1x512xi1> to vector<8x512xi1>
    %197 = vector.broadcast %cst_72 : f32 to vector<8x512xf32>
    %198 = arith.select %196, %189, %197 : vector<8x512xi1>, vector<8x512xf32>
    %c30_i32 = arith.constant 30 : i32
    %199 = tpu.dynamic_rotate %92 by %c30_i32 dim 1 : vector<8x512xf32>, i32 -> vector<8x512xf32>
    %c2_i32_73 = arith.constant 2 : i32
    %200 = vector.broadcast %c2_i32_73 : i32 to vector<1x512xi32>
    %201 = arith.cmpi sge, %8, %200 : vector<1x512xi32>
    %c14_i32 = arith.constant 14 : i32
    %202 = vector.broadcast %c14_i32 : i32 to vector<1x512xi32>
    %203 = arith.cmpi slt, %4, %202 : vector<1x512xi32>
    %204 = arith.andi %201, %203 : vector<1x512xi1>
    %cst_74 = arith.constant 0.000000e+00 : f32
    %205 = vector.shape_cast %204 : vector<1x512xi1> to vector<1x512xi1>
    %206 = vector.broadcast %205 : vector<1x512xi1> to vector<8x512xi1>
    %207 = vector.broadcast %cst_74 : f32 to vector<8x512xf32>
    %208 = arith.select %206, %199, %207 : vector<8x512xi1>, vector<8x512xf32>
    %209 = tpu.concatenate %171, %181, %188, %198, %208 in 0 : vector<8x512xf32>, vector<8x512xf32>, vector<8x512xf32>, vector<8x512xf32>, vector<8x512xf32> -> vector<40x512xf32>
    %c0_75 = arith.constant 0 : index
    %c0_76 = arith.constant 0 : index
    %c0_77 = arith.constant 0 : index
    %210 = vector.load %arg4[%c0_75, %c0_76, %c0_77] : memref<5x8x40xf32, #tpu.memory_space<vmem>>, vector<1x8x40xf32>
    %211 = vector.shape_cast %210 : vector<1x8x40xf32> to vector<8x40xf32>
    %cst_78 = arith.constant dense<0.000000e+00> : vector<8x512xf32>
    %212 = tpu.matmul %211, %209, %cst_78 {dimension_numbers = #tpu.dot_dimension_numbers<[1], [0], [0], [1], [0, 0, 1, 1], [], []>} : vector<8x40xf32>, vector<40x512xf32>, vector<8x512xf32> -> vector<8x512xf32>
    %213 = arith.addf %161, %212 : vector<8x512xf32>
    %c18_i32 = arith.constant 18 : i32
    %214 = tpu.dynamic_rotate %92 by %c18_i32 dim 1 : vector<8x512xf32>, i32 -> vector<8x512xf32>
    %c1_i32_79 = arith.constant 1 : i32
    %215 = vector.broadcast %c1_i32_79 : i32 to vector<1x512xi32>
    %216 = arith.cmpi sge, %8, %215 : vector<1x512xi32>
    %c2_i32_80 = arith.constant 2 : i32
    %217 = vector.broadcast %c2_i32_80 : i32 to vector<1x512xi32>
    %218 = arith.cmpi sge, %4, %217 : vector<1x512xi32>
    %219 = arith.andi %216, %218 : vector<1x512xi1>
    %cst_81 = arith.constant 0.000000e+00 : f32
    %220 = vector.shape_cast %219 : vector<1x512xi1> to vector<1x512xi1>
    %221 = vector.broadcast %220 : vector<1x512xi1> to vector<8x512xi1>
    %222 = vector.broadcast %cst_81 : f32 to vector<8x512xf32>
    %223 = arith.select %221, %214, %222 : vector<8x512xi1>, vector<8x512xf32>
    %c17_i32_82 = arith.constant 17 : i32
    %224 = tpu.dynamic_rotate %92 by %c17_i32_82 dim 1 : vector<8x512xf32>, i32 -> vector<8x512xf32>
    %cst_83 = arith.constant 0.000000e+00 : f32
    %225 = vector.shape_cast %14 : vector<1x512xi1> to vector<1x512xi1>
    %226 = vector.broadcast %225 : vector<1x512xi1> to vector<8x512xi1>
    %227 = vector.broadcast %cst_83 : f32 to vector<8x512xf32>
    %228 = arith.select %226, %224, %227 : vector<8x512xi1>, vector<8x512xf32>
    %c16_i32_84 = arith.constant 16 : i32
    %229 = tpu.dynamic_rotate %92 by %c16_i32_84 dim 1 : vector<8x512xf32>, i32 -> vector<8x512xf32>
    %cst_85 = arith.constant 0.000000e+00 : f32
    %230 = vector.shape_cast %22 : vector<1x512xi1> to vector<1x512xi1>
    %231 = vector.broadcast %230 : vector<1x512xi1> to vector<8x512xi1>
    %232 = vector.broadcast %cst_85 : f32 to vector<8x512xf32>
    %233 = arith.select %231, %229, %232 : vector<8x512xi1>, vector<8x512xf32>
    %c15_i32_86 = arith.constant 15 : i32
    %234 = tpu.dynamic_rotate %92 by %c15_i32_86 dim 1 : vector<8x512xf32>, i32 -> vector<8x512xf32>
    %cst_87 = arith.constant 0.000000e+00 : f32
    %235 = vector.shape_cast %33 : vector<1x512xi1> to vector<1x512xi1>
    %236 = vector.broadcast %235 : vector<1x512xi1> to vector<8x512xi1>
    %237 = vector.broadcast %cst_87 : f32 to vector<8x512xf32>
    %238 = arith.select %236, %234, %237 : vector<8x512xi1>, vector<8x512xf32>
    %c14_i32_88 = arith.constant 14 : i32
    %239 = tpu.dynamic_rotate %92 by %c14_i32_88 dim 1 : vector<8x512xf32>, i32 -> vector<8x512xf32>
    %c1_i32_89 = arith.constant 1 : i32
    %240 = vector.broadcast %c1_i32_89 : i32 to vector<1x512xi32>
    %241 = arith.cmpi sge, %8, %240 : vector<1x512xi32>
    %c14_i32_90 = arith.constant 14 : i32
    %242 = vector.broadcast %c14_i32_90 : i32 to vector<1x512xi32>
    %243 = arith.cmpi slt, %4, %242 : vector<1x512xi32>
    %244 = arith.andi %241, %243 : vector<1x512xi1>
    %cst_91 = arith.constant 0.000000e+00 : f32
    %245 = vector.shape_cast %244 : vector<1x512xi1> to vector<1x512xi1>
    %246 = vector.broadcast %245 : vector<1x512xi1> to vector<8x512xi1>
    %247 = vector.broadcast %cst_91 : f32 to vector<8x512xf32>
    %248 = arith.select %246, %239, %247 : vector<8x512xi1>, vector<8x512xf32>
    %249 = tpu.concatenate %223, %228, %233, %238, %248 in 0 : vector<8x512xf32>, vector<8x512xf32>, vector<8x512xf32>, vector<8x512xf32>, vector<8x512xf32> -> vector<40x512xf32>
    %c1_92 = arith.constant 1 : index
    %c0_93 = arith.constant 0 : index
    %c0_94 = arith.constant 0 : index
    %250 = vector.load %arg4[%c1_92, %c0_93, %c0_94] : memref<5x8x40xf32, #tpu.memory_space<vmem>>, vector<1x8x40xf32>
    %251 = vector.shape_cast %250 : vector<1x8x40xf32> to vector<8x40xf32>
    %cst_95 = arith.constant dense<0.000000e+00> : vector<8x512xf32>
    %252 = tpu.matmul %251, %249, %cst_95 {dimension_numbers = #tpu.dot_dimension_numbers<[1], [0], [0], [1], [0, 0, 1, 1], [], []>} : vector<8x40xf32>, vector<40x512xf32>, vector<8x512xf32> -> vector<8x512xf32>
    %253 = arith.addf %213, %252 : vector<8x512xf32>
    %c2_i32_96 = arith.constant 2 : i32
    %254 = tpu.dynamic_rotate %92 by %c2_i32_96 dim 1 : vector<8x512xf32>, i32 -> vector<8x512xf32>
    %c2_i32_97 = arith.constant 2 : i32
    %255 = vector.broadcast %c2_i32_97 : i32 to vector<1x512xi32>
    %256 = arith.cmpi sge, %4, %255 : vector<1x512xi32>
    %cst_98 = arith.constant 0.000000e+00 : f32
    %257 = vector.shape_cast %256 : vector<1x512xi1> to vector<1x512xi1>
    %258 = vector.broadcast %257 : vector<1x512xi1> to vector<8x512xi1>
    %259 = vector.broadcast %cst_98 : f32 to vector<8x512xf32>
    %260 = arith.select %258, %254, %259 : vector<8x512xi1>, vector<8x512xf32>
    %c1_i32_99 = arith.constant 1 : i32
    %261 = tpu.dynamic_rotate %92 by %c1_i32_99 dim 1 : vector<8x512xf32>, i32 -> vector<8x512xf32>
    %cst_100 = arith.constant 0.000000e+00 : f32
    %262 = vector.shape_cast %41 : vector<1x512xi1> to vector<1x512xi1>
    %263 = vector.broadcast %262 : vector<1x512xi1> to vector<8x512xi1>
    %264 = vector.broadcast %cst_100 : f32 to vector<8x512xf32>
    %265 = arith.select %263, %261, %264 : vector<8x512xi1>, vector<8x512xf32>
    %c511_i32_101 = arith.constant 511 : i32
    %266 = tpu.dynamic_rotate %92 by %c511_i32_101 dim 1 : vector<8x512xf32>, i32 -> vector<8x512xf32>
    %cst_102 = arith.constant 0.000000e+00 : f32
    %267 = vector.shape_cast %49 : vector<1x512xi1> to vector<1x512xi1>
    %268 = vector.broadcast %267 : vector<1x512xi1> to vector<8x512xi1>
    %269 = vector.broadcast %cst_102 : f32 to vector<8x512xf32>
    %270 = arith.select %268, %266, %269 : vector<8x512xi1>, vector<8x512xf32>
    %c510_i32 = arith.constant 510 : i32
    %271 = tpu.dynamic_rotate %92 by %c510_i32 dim 1 : vector<8x512xf32>, i32 -> vector<8x512xf32>
    %c14_i32_103 = arith.constant 14 : i32
    %272 = vector.broadcast %c14_i32_103 : i32 to vector<1x512xi32>
    %273 = arith.cmpi slt, %4, %272 : vector<1x512xi32>
    %cst_104 = arith.constant 0.000000e+00 : f32
    %274 = vector.shape_cast %273 : vector<1x512xi1> to vector<1x512xi1>
    %275 = vector.broadcast %274 : vector<1x512xi1> to vector<8x512xi1>
    %276 = vector.broadcast %cst_104 : f32 to vector<8x512xf32>
    %277 = arith.select %275, %271, %276 : vector<8x512xi1>, vector<8x512xf32>
    %278 = tpu.concatenate %260, %265, %92, %270, %277 in 0 : vector<8x512xf32>, vector<8x512xf32>, vector<8x512xf32>, vector<8x512xf32>, vector<8x512xf32> -> vector<40x512xf32>
    %c2_105 = arith.constant 2 : index
    %c0_106 = arith.constant 0 : index
    %c0_107 = arith.constant 0 : index
    %279 = vector.load %arg4[%c2_105, %c0_106, %c0_107] : memref<5x8x40xf32, #tpu.memory_space<vmem>>, vector<1x8x40xf32>
    %280 = vector.shape_cast %279 : vector<1x8x40xf32> to vector<8x40xf32>
    %cst_108 = arith.constant dense<0.000000e+00> : vector<8x512xf32>
    %281 = tpu.matmul %280, %278, %cst_108 {dimension_numbers = #tpu.dot_dimension_numbers<[1], [0], [0], [1], [0, 0, 1, 1], [], []>} : vector<8x40xf32>, vector<40x512xf32>, vector<8x512xf32> -> vector<8x512xf32>
    %282 = arith.addf %253, %281 : vector<8x512xf32>
    %c498_i32 = arith.constant 498 : i32
    %283 = tpu.dynamic_rotate %92 by %c498_i32 dim 1 : vector<8x512xf32>, i32 -> vector<8x512xf32>
    %c15_i32_109 = arith.constant 15 : i32
    %284 = vector.broadcast %c15_i32_109 : i32 to vector<1x512xi32>
    %285 = arith.cmpi slt, %8, %284 : vector<1x512xi32>
    %c2_i32_110 = arith.constant 2 : i32
    %286 = vector.broadcast %c2_i32_110 : i32 to vector<1x512xi32>
    %287 = arith.cmpi sge, %4, %286 : vector<1x512xi32>
    %288 = arith.andi %285, %287 : vector<1x512xi1>
    %cst_111 = arith.constant 0.000000e+00 : f32
    %289 = vector.shape_cast %288 : vector<1x512xi1> to vector<1x512xi1>
    %290 = vector.broadcast %289 : vector<1x512xi1> to vector<8x512xi1>
    %291 = vector.broadcast %cst_111 : f32 to vector<8x512xf32>
    %292 = arith.select %290, %283, %291 : vector<8x512xi1>, vector<8x512xf32>
    %c497_i32_112 = arith.constant 497 : i32
    %293 = tpu.dynamic_rotate %92 by %c497_i32_112 dim 1 : vector<8x512xf32>, i32 -> vector<8x512xf32>
    %cst_113 = arith.constant 0.000000e+00 : f32
    %294 = vector.shape_cast %60 : vector<1x512xi1> to vector<1x512xi1>
    %295 = vector.broadcast %294 : vector<1x512xi1> to vector<8x512xi1>
    %296 = vector.broadcast %cst_113 : f32 to vector<8x512xf32>
    %297 = arith.select %295, %293, %296 : vector<8x512xi1>, vector<8x512xf32>
    %c496_i32_114 = arith.constant 496 : i32
    %298 = tpu.dynamic_rotate %92 by %c496_i32_114 dim 1 : vector<8x512xf32>, i32 -> vector<8x512xf32>
    %cst_115 = arith.constant 0.000000e+00 : f32
    %299 = vector.shape_cast %68 : vector<1x512xi1> to vector<1x512xi1>
    %300 = vector.broadcast %299 : vector<1x512xi1> to vector<8x512xi1>
    %301 = vector.broadcast %cst_115 : f32 to vector<8x512xf32>
    %302 = arith.select %300, %298, %301 : vector<8x512xi1>, vector<8x512xf32>
    %c495_i32_116 = arith.constant 495 : i32
    %303 = tpu.dynamic_rotate %92 by %c495_i32_116 dim 1 : vector<8x512xf32>, i32 -> vector<8x512xf32>
    %cst_117 = arith.constant 0.000000e+00 : f32
    %304 = vector.shape_cast %79 : vector<1x512xi1> to vector<1x512xi1>
    %305 = vector.broadcast %304 : vector<1x512xi1> to vector<8x512xi1>
    %306 = vector.broadcast %cst_117 : f32 to vector<8x512xf32>
    %307 = arith.select %305, %303, %306 : vector<8x512xi1>, vector<8x512xf32>
    %c494_i32 = arith.constant 494 : i32
    %308 = tpu.dynamic_rotate %92 by %c494_i32 dim 1 : vector<8x512xf32>, i32 -> vector<8x512xf32>
    %c15_i32_118 = arith.constant 15 : i32
    %309 = vector.broadcast %c15_i32_118 : i32 to vector<1x512xi32>
    %310 = arith.cmpi slt, %8, %309 : vector<1x512xi32>
    %c14_i32_119 = arith.constant 14 : i32
    %311 = vector.broadcast %c14_i32_119 : i32 to vector<1x512xi32>
    %312 = arith.cmpi slt, %4, %311 : vector<1x512xi32>
    %313 = arith.andi %310, %312 : vector<1x512xi1>
    %cst_120 = arith.constant 0.000000e+00 : f32
    %314 = vector.shape_cast %313 : vector<1x512xi1> to vector<1x512xi1>
    %315 = vector.broadcast %314 : vector<1x512xi1> to vector<8x512xi1>
    %316 = vector.broadcast %cst_120 : f32 to vector<8x512xf32>
    %317 = arith.select %315, %308, %316 : vector<8x512xi1>, vector<8x512xf32>
    %318 = tpu.concatenate %292, %297, %302, %307, %317 in 0 : vector<8x512xf32>, vector<8x512xf32>, vector<8x512xf32>, vector<8x512xf32>, vector<8x512xf32> -> vector<40x512xf32>
    %c3 = arith.constant 3 : index
    %c0_121 = arith.constant 0 : index
    %c0_122 = arith.constant 0 : index
    %319 = vector.load %arg4[%c3, %c0_121, %c0_122] : memref<5x8x40xf32, #tpu.memory_space<vmem>>, vector<1x8x40xf32>
    %320 = vector.shape_cast %319 : vector<1x8x40xf32> to vector<8x40xf32>
    %cst_123 = arith.constant dense<0.000000e+00> : vector<8x512xf32>
    %321 = tpu.matmul %320, %318, %cst_123 {dimension_numbers = #tpu.dot_dimension_numbers<[1], [0], [0], [1], [0, 0, 1, 1], [], []>} : vector<8x40xf32>, vector<40x512xf32>, vector<8x512xf32> -> vector<8x512xf32>
    %322 = arith.addf %282, %321 : vector<8x512xf32>
    %c482_i32 = arith.constant 482 : i32
    %323 = tpu.dynamic_rotate %92 by %c482_i32 dim 1 : vector<8x512xf32>, i32 -> vector<8x512xf32>
    %c14_i32_124 = arith.constant 14 : i32
    %324 = vector.broadcast %c14_i32_124 : i32 to vector<1x512xi32>
    %325 = arith.cmpi slt, %8, %324 : vector<1x512xi32>
    %c2_i32_125 = arith.constant 2 : i32
    %326 = vector.broadcast %c2_i32_125 : i32 to vector<1x512xi32>
    %327 = arith.cmpi sge, %4, %326 : vector<1x512xi32>
    %328 = arith.andi %325, %327 : vector<1x512xi1>
    %cst_126 = arith.constant 0.000000e+00 : f32
    %329 = vector.shape_cast %328 : vector<1x512xi1> to vector<1x512xi1>
    %330 = vector.broadcast %329 : vector<1x512xi1> to vector<8x512xi1>
    %331 = vector.broadcast %cst_126 : f32 to vector<8x512xf32>
    %332 = arith.select %330, %323, %331 : vector<8x512xi1>, vector<8x512xf32>
    %c481_i32 = arith.constant 481 : i32
    %333 = tpu.dynamic_rotate %92 by %c481_i32 dim 1 : vector<8x512xf32>, i32 -> vector<8x512xf32>
    %c14_i32_127 = arith.constant 14 : i32
    %334 = vector.broadcast %c14_i32_127 : i32 to vector<1x512xi32>
    %335 = arith.cmpi slt, %8, %334 : vector<1x512xi32>
    %c1_i32_128 = arith.constant 1 : i32
    %336 = vector.broadcast %c1_i32_128 : i32 to vector<1x512xi32>
    %337 = arith.cmpi sge, %4, %336 : vector<1x512xi32>
    %338 = arith.andi %335, %337 : vector<1x512xi1>
    %cst_129 = arith.constant 0.000000e+00 : f32
    %339 = vector.shape_cast %338 : vector<1x512xi1> to vector<1x512xi1>
    %340 = vector.broadcast %339 : vector<1x512xi1> to vector<8x512xi1>
    %341 = vector.broadcast %cst_129 : f32 to vector<8x512xf32>
    %342 = arith.select %340, %333, %341 : vector<8x512xi1>, vector<8x512xf32>
    %c480_i32 = arith.constant 480 : i32
    %343 = tpu.dynamic_rotate %92 by %c480_i32 dim 1 : vector<8x512xf32>, i32 -> vector<8x512xf32>
    %c14_i32_130 = arith.constant 14 : i32
    %344 = vector.broadcast %c14_i32_130 : i32 to vector<1x512xi32>
    %345 = arith.cmpi slt, %8, %344 : vector<1x512xi32>
    %cst_131 = arith.constant 0.000000e+00 : f32
    %346 = vector.shape_cast %345 : vector<1x512xi1> to vector<1x512xi1>
    %347 = vector.broadcast %346 : vector<1x512xi1> to vector<8x512xi1>
    %348 = vector.broadcast %cst_131 : f32 to vector<8x512xf32>
    %349 = arith.select %347, %343, %348 : vector<8x512xi1>, vector<8x512xf32>
    %c479_i32 = arith.constant 479 : i32
    %350 = tpu.dynamic_rotate %92 by %c479_i32 dim 1 : vector<8x512xf32>, i32 -> vector<8x512xf32>
    %c14_i32_132 = arith.constant 14 : i32
    %351 = vector.broadcast %c14_i32_132 : i32 to vector<1x512xi32>
    %352 = arith.cmpi slt, %8, %351 : vector<1x512xi32>
    %c15_i32_133 = arith.constant 15 : i32
    %353 = vector.broadcast %c15_i32_133 : i32 to vector<1x512xi32>
    %354 = arith.cmpi slt, %4, %353 : vector<1x512xi32>
    %355 = arith.andi %352, %354 : vector<1x512xi1>
    %cst_134 = arith.constant 0.000000e+00 : f32
    %356 = vector.shape_cast %355 : vector<1x512xi1> to vector<1x512xi1>
    %357 = vector.broadcast %356 : vector<1x512xi1> to vector<8x512xi1>
    %358 = vector.broadcast %cst_134 : f32 to vector<8x512xf32>
    %359 = arith.select %357, %350, %358 : vector<8x512xi1>, vector<8x512xf32>
    %c478_i32 = arith.constant 478 : i32
    %360 = tpu.dynamic_rotate %92 by %c478_i32 dim 1 : vector<8x512xf32>, i32 -> vector<8x512xf32>
    %c14_i32_135 = arith.constant 14 : i32
    %361 = vector.broadcast %c14_i32_135 : i32 to vector<1x512xi32>
    %362 = arith.cmpi slt, %8, %361 : vector<1x512xi32>
    %c14_i32_136 = arith.constant 14 : i32
    %363 = vector.broadcast %c14_i32_136 : i32 to vector<1x512xi32>
    %364 = arith.cmpi slt, %4, %363 : vector<1x512xi32>
    %365 = arith.andi %362, %364 : vector<1x512xi1>
    %cst_137 = arith.constant 0.000000e+00 : f32
    %366 = vector.shape_cast %365 : vector<1x512xi1> to vector<1x512xi1>
    %367 = vector.broadcast %366 : vector<1x512xi1> to vector<8x512xi1>
    %368 = vector.broadcast %cst_137 : f32 to vector<8x512xf32>
    %369 = arith.select %367, %360, %368 : vector<8x512xi1>, vector<8x512xf32>
    %370 = tpu.concatenate %332, %342, %349, %359, %369 in 0 : vector<8x512xf32>, vector<8x512xf32>, vector<8x512xf32>, vector<8x512xf32>, vector<8x512xf32> -> vector<40x512xf32>
    %c4 = arith.constant 4 : index
    %c0_138 = arith.constant 0 : index
    %c0_139 = arith.constant 0 : index
    %371 = vector.load %arg4[%c4, %c0_138, %c0_139] : memref<5x8x40xf32, #tpu.memory_space<vmem>>, vector<1x8x40xf32>
    %372 = vector.shape_cast %371 : vector<1x8x40xf32> to vector<8x40xf32>
    %cst_140 = arith.constant dense<0.000000e+00> : vector<8x512xf32>
    %373 = tpu.matmul %372, %370, %cst_140 {dimension_numbers = #tpu.dot_dimension_numbers<[1], [0], [0], [1], [0, 0, 1, 1], [], []>} : vector<8x40xf32>, vector<40x512xf32>, vector<8x512xf32> -> vector<8x512xf32>
    %374 = arith.addf %322, %373 : vector<8x512xf32>
    %cst_141 = arith.constant 0.000000e+00 : f32
    %375 = vector.broadcast %cst_141 : f32 to vector<8x512xf32>
    %376 = arith.maximumf %374, %375 : vector<8x512xf32>
    %c0_142 = arith.constant 0 : index
    %c16 = arith.constant 16 : index
    %c0_143 = arith.constant 0 : index
    %377 = vector.load %arg5[%c0_142, %c16, %c0_143] : memref<1x32x512xf32, #tpu.memory_space<vmem>>, vector<1x8x512xf32>
    %378 = vector.shape_cast %377 : vector<1x8x512xf32> to vector<8x512xf32>
    %379 = vector.shape_cast %376 : vector<8x512xf32> to vector<1x8x512xf32>
    tpu.vector_store %arg5[%c0_142, %c16, %c0_143], %379 {strides = array<i32>} : memref<1x32x512xf32, #tpu.memory_space<vmem>>, vector<1x8x512xf32>,
    return
  }
  func.func @transform_0(%arg0: i32) -> (i32, i32, i32) {
    %c0_i32 = arith.constant 0 : i32
    %c0_i32_0 = arith.constant 0 : i32
    %c0_i32_1 = arith.constant 0 : i32
    return %arg0, %c0_i32, %c0_i32_0 : i32, i32, i32
  }
  func.func @transform_1(%arg0: i32) -> (i32, i32) {
    %c0_i32 = arith.constant 0 : i32
    %c0_i32_0 = arith.constant 0 : i32
    %c0_i32_1 = arith.constant 0 : i32
    return %c0_i32, %c0_i32_0 : i32, i32
  }
  func.func @transform_2(%arg0: i32) -> (i32, i32, i32) {
    %c0_i32 = arith.constant 0 : i32
    %c0_i32_0 = arith.constant 0 : i32
    %c0_i32_1 = arith.constant 0 : i32
    %c0_i32_2 = arith.constant 0 : i32
    return %c0_i32, %c0_i32_0, %c0_i32_1 : i32, i32, i32
  }
  func.func @transform_3(%arg0: i32) -> (i32, i32, i32) {
    %c0_i32 = arith.constant 0 : i32
    %c0_i32_0 = arith.constant 0 : i32
    %c0_i32_1 = arith.constant 0 : i32
    %c0_i32_2 = arith.constant 0 : i32
    return %c0_i32, %c0_i32_0, %c0_i32_1 : i32, i32, i32
  }
  func.func @transform_4(%arg0: i32) -> (i32, i32, i32) {
    %c0_i32 = arith.constant 0 : i32
    %c0_i32_0 = arith.constant 0 : i32
    %c0_i32_1 = arith.constant 0 : i32
    return %arg0, %c0_i32, %c0_i32_0 : i32, i32, i32
  }
}

</mosaic_0001>

<bundles_post_ra>
// kernel: inception_block.1
= control target key start
LH: loop header
LB: loop body
LE: loop exit
PB: predicated region body
PF: predicated region fallthrough
CT: control target
= control target key end

     0   :  { %s3145_s23 = smov 16   ;;  %s3146_s24 = smov 17   ;;  %v5127_v6 = vmov 0.0   ;;  %v21_v7 = vlaneseq  ;;  %v5141_v57 = vmov 0  ;;  %v5143_v63 = vmov 0  ;;  %s5079_s0 = inlined_call_operand.vmem [shape: f32[1,8,512], index: 0, kind: input, shape index: {}]   ;;  %s5080_s1 = inlined_call_operand.vmem [shape: f32[32,16], index: 1, kind: input, shape index: {}]   ;;  %s5081_s4 = inlined_call_operand.vmem [shape: f32[1,32,512], index: 4, kind: output, shape index: {}]   ;;  %s5082_s2 = inlined_call_operand.vmem [shape: f32[3,8,24], index: 2, kind: input, shape index: {}]   ;;  %s5083_s3 = inlined_call_operand.vmem [shape: f32[5,8,40], index: 3, kind: input, shape index: {}]  }
   0x1   :  { %v3199_v0 = vld [vmem:[%s5079_s0] sm:$0xff]  ;;  %v3204_v1 = vld [vmem:[%s5079_s0 + $0x8] sm:$0xff]  ;;  %v3209_v2 = vld [vmem:[%s5079_s0 + $0x10] sm:$0xff]  ;;  %s3147_s25 = smov 15   ;;  %s3149_s26 = smov 127   ;;  %383 = vmatprep.mubr.f32.mxu0 %v5127_v6  ;;  %472 = vmatprep.mubr.f32.mxu1 %v5127_v6 }
   0x2   :  { %v2835_v3 = vpack.i.bf16 %v3204_v1, %v3199_v0  ;;  %v3216_v4 = vld [vmem:[%s5079_s0 + $0x18] sm:$0xff]  ;;  %s3148_s0 = smov 1   ;;  %s3150_s27 = smov 113   ;;  %v3238_v8 = vand.u32 127, %v21_v7  ;;  %v5145_v7 = vmov 0 }
   0x3   :  { %v2840_v5 = vpack.i.bf16 %v3216_v4, %v3209_v2  ;;  %s3151_s28 = smov 112   ;;  %s3152_s29 = smov 111  }
   0x4   :  { %2836 = vrot.lane.b32.xlu1 %v2835_v3, %s3145_s23  ;;  %2826 = vrot.lane.b32.xlu0 %v2835_v3, %s3146_s24  ;;  %v23_v9 = vadd.s32 128, %v3238_v8  ;;  %v25_v11 = vadd.s32 384, %v3238_v8  ;;  %v24_v12 = vadd.s32 256, %v3238_v8  ;;  %v30_v15 = vshra.s32 %v3238_v8, 4  ;;  %s3155_s20 = smov 18   ;;  %s3156_s21 = smov 30  }
   0x5   :  { %v3253_v19 = vand.u32 15, %v3238_v8  ;;  %vm5087_vm2 = vcmp.lt.s32.totalorder %v3238_v8, 16  ;;  %vm5088_vm3 = vcmp.lt.s32.totalorder %v3238_v8, 17  ;;  %vm5096_vm7 = vcmp.lt.s32.totalorder %v3238_v8, 15  ;;  %s3157_s22 = smov 126   ;;  %s3158_s30 = smov 34  }
   0x6   :  { %v31_v10 = vshra.s32 %v23_v9, 4  ;;  %v3245_v14 = vand.u32 15, %v23_v9  ;;  %v33_v16 = vshra.s32 %v25_v11, 4  ;;  %v32_v17 = vshra.s32 %v24_v12, 4  ;;  %s3159_s5 = smov 110   ;;  %s3160_s6 = smov 33  }
   0x7   :  { %v3250_v18 = vand.u32 15, %v30_v15  ;;  %v3257_v21 = vand.u32 15, %v25_v11  ;;  %v3263_v25 = vand.u32 15, %v24_v12  ;;  %vm5085_vm6 = vcmp.ge.s32.totalorder %v3253_v19, 1  ;;  %s3161_s7 = smov 32   ;;  %s3162_s8 = smov 31  }
   0x8   :  { %2841 = vrot.lane.b32.xlu1 %v2840_v5, %s3145_s23  ;;  %2831 = vrot.lane.b32.xlu0 %v2840_v5, %s3146_s24  ;;  %v3243_v13 = vand.u32 15, %v31_v10  ;;  %vm5084_vm1 = vcmp.ge.s32.totalorder %v3245_v14, 1  ;;  %v3255_v20 = vand.u32 15, %v33_v16  ;;  %v3261_v24 = vand.u32 15, %v32_v17  ;;  %s3170_s9 = smov 94  }
   0x9   :  { %vm5095_vm5 = vcmp.ge.s32.totalorder %v3250_v18, 1  ;;  %vm5086_vm9 = vcmp.ge.s32.totalorder %v3257_v21, 1  ;;  %vm5090_vm11 = vcmp.ge.s32.totalorder %v3263_v25, 1  ;;  %vm5089_vm12 = vcmp.lt.s32.totalorder %v3257_v21, 15 }
   0xa   :  { %vm5091_vm0 = vcmp.ge.s32.totalorder %v3243_v13, 1  ;;  %vm5092_vm8 = vcmp.ge.s32.totalorder %v3255_v20, 1  ;;  %vm5094_vm10 = vcmp.ge.s32.totalorder %v3261_v24, 1  ;;  %vm3291_vm13 = vmand %vm5095_vm5, %vm5085_vm6  ;;  %vm5100_vm6 = vcmp.lt.s32.totalorder %v3263_v25, 15 }
   0xb   :  { %vm3269_vm4 = vmand %vm5091_vm0, %vm5084_vm1  ;;  %vm5093_vm1 = vcmp.lt.s32.totalorder %v3245_v14, 15  ;;  %vm5097_vm14 = vcmp.lt.s32.totalorder %v3238_v8, 1  ;;  %v5148_v15 = vmov 0 }
   0xc   :  { %2851 = vrot.lane.b32.xlu1 %v2840_v5, %s3147_s25  ;;  %2846 = vrot.lane.b32.xlu0 %v2835_v3, %s3147_s25  ;;  %vm3302_vm15 = vmand %vm5092_vm8, %vm5086_vm9 }
   0xd   :  { %vm3317_vm9 = vmand %vm5094_vm10, %vm5090_vm11 }
   0xe   :  { %vm3366_vm11 = vmand %vm5094_vm10, %vm5100_vm6 }
   0xf   :  { %v5146_v7 = vsel %vm3366_vm11, 4294967295, %v5145_v7 }
  0x10   :  { %2861 = vrot.lane.b32.xlu1 %v2840_v5, %s3148_s0  ;;  %2856 = vrot.lane.b32.xlu0 %v2835_v3, %s3148_s0 }
  0x14   :  { %2871 = vrot.lane.b32.xlu1 %v2840_v5, %s3149_s26  ;;  %2866 = vrot.lane.b32.xlu0 %v2835_v3, %s3149_s26 }
  0x18   :  { %2881 = vrot.lane.b32.xlu1 %v2840_v5, %s3150_s27  ;;  %2876 = vrot.lane.b32.xlu0 %v2835_v3, %s3150_s27 }
  0x1c   :  { %2891 = vrot.lane.b32.xlu1 %v2840_v5, %s3151_s28  ;;  %2886 = vrot.lane.b32.xlu0 %v2835_v3, %s3151_s28 }
  0x20   :  { %2901 = vrot.lane.b32.xlu1 %v2840_v5, %s3152_s29  ;;  %2896 = vrot.lane.b32.xlu0 %v2835_v3, %s3152_s29 }
  0x76   :  { %v2837_v22 = vpop.permute.xlu1 %2836  ;;  %v2827_v23 = vpop.permute.xlu0 %2826 }
  0x77   :  { %v2839_v26 = vunpack.i.h.bf16 %v2837_v22  ;;  %v2838_v27 = vunpack.i.l.bf16 %v2837_v22  ;;  %v2829_v29 = vunpack.i.h.bf16 %v2827_v23  ;;  %v2828_v30 = vunpack.i.l.bf16 %v2827_v23 }
  0x79   :  { %v90_v31 = vsel %vm5087_vm2, %v2838_v27, %v2839_v26  ;;  %v49_v32 = vsel %vm5088_vm3, %v2828_v30, %v2829_v29 }
  0x7a   :  { %v72_v33 = vsel %vm3269_vm4, %v49_v32, -inf  ;;  %v2842_v34 = vpop.permute.xlu1 %2841  ;;  %v2832_v35 = vpop.permute.xlu0 %2831  ;;  %v101_v40 = vsel %vm5091_vm0, %v90_v31, -inf }
  0x7b   :  { %v2844_v36 = vunpack.i.h.bf16 %v2842_v34  ;;  %v2843_v37 = vunpack.i.l.bf16 %v2842_v34  ;;  %v2834_v39 = vunpack.i.h.bf16 %v2832_v35  ;;  %v2833_v42 = vunpack.i.l.bf16 %v2832_v35 }
  0x7c   :  { %v76_v43 = vmax.f32 %v3204_v1, %v72_v33 }
  0x7d   :  { %v89_v44 = vsel %vm5087_vm2, %v2839_v26, %v2843_v37  ;;  %v91_v45 = vsel %vm5087_vm2, %v2844_v36, %v2838_v27  ;;  %v50_v47 = vsel %vm5088_vm3, %v2834_v39, %v2828_v30  ;;  %v88_v48 = vsel %vm5087_vm2, %v2843_v37, %v2844_v36  ;;  %vm3342_vm2 = vmand %vm5092_vm8, %vm5089_vm12 }
  0x7e   :  { %v100_v49 = vsel %vm5095_vm5, %v91_v45, -inf  ;;  %v102_v50 = vsel %vm5094_vm10, %v89_v44, -inf  ;;  %v47_v51 = vsel %vm5088_vm3, %v2833_v42, %v2834_v39  ;;  %v2852_v52 = vpop.permute.xlu1 %2851  ;;  %v2847_v53 = vpop.permute.xlu0 %2846  ;;  %v48_v54 = vsel %vm5088_vm3, %v2829_v29, %v2833_v42  ;;  %vm3354_vm3 = vmand %vm5091_vm0, %vm5093_vm1 }
  0x7f   :  { %v71_v55 = vsel %vm3291_vm13, %v50_v47, -inf  ;;  %v74_v56 = vsel %vm3302_vm15, %v47_v51, -inf  ;;  %v5142_v57 = vsel %vm3342_vm2, 4294967295, %v5141_v57  ;;  %v2854_v58 = vunpack.i.h.bf16 %v2852_v52 }
  0x80   :  { %v73_v59 = vsel %vm3317_vm9, %v48_v54, -inf  ;;  %v75_v60 = vmax.f32 %v3199_v0, %v71_v55  ;;  %v78_v61 = vmax.f32 %v3216_v4, %v74_v56  ;;  %v2853_v62 = vunpack.i.l.bf16 %v2852_v52 }
  0x81   :  { %v5144_v63 = vsel %vm3354_vm3, 4294967295, %v5143_v63  ;;  %vm5098_vm12 = vcmp.lt.s32.totalorder %v3238_v8, 127  ;;  %v103_v3 = vsel %vm5092_vm8, %v88_v48, -inf  ;;  %v77_v5 = vmax.f32 %v3209_v2, %v73_v59 }
  0x82   :  { %v2849_v9 = vunpack.i.h.bf16 %v2847_v53  ;;  %v2848_v10 = vunpack.i.l.bf16 %v2847_v53  ;;  %vm5099_vm0 = vcmp.lt.s32.totalorder %v3261_v24, 15  ;;  %v107_v11 = vmax.f32 %v78_v61, %v103_v3  ;;  %v2862_v22 = vpop.permute.xlu1 %2861  ;;  %v2857_v23 = vpop.permute.xlu0 %2856 }
  0x83   :  { %v117_v12 = vsel %vm5096_vm7, %v2853_v62, %v2854_v58  ;;  %vm5147_vm8 = vcmp.lt.s32.totalorder %v3253_v19, 15  ;;  %v104_v16 = vmax.f32 %v75_v60, %v100_v49  ;;  %v105_v17 = vmax.f32 %v76_v43, %v101_v40 }
  0x84   :  { %vm3377_vm1 = vmand %vm5095_vm5, %vm5147_vm8  ;;  %v140_v26 = vsel %vm3342_vm2, %v117_v12, -inf  ;;  %v118_v27 = vsel %vm5096_vm7, %v2849_v9, %v2853_v62  ;;  %v106_v29 = vmax.f32 %v77_v5, %v102_v50  ;;  %v119_v30 = vsel %vm5096_vm7, %v2848_v10, %v2849_v9 }
  0x85   :  { %v5149_v15 = vsel %vm3377_vm1, 4294967295, %v5148_v15  ;;  %v144_v31 = vmax.f32 %v107_v11, %v140_v26  ;;  %v139_v32 = vsel %vm3366_vm11, %v118_v27, -inf  ;;  %v120_v33 = vsel %vm5096_vm7, %v2854_v58, %v2848_v10 }
  0x86   :  { %v138_v34 = vsel %vm3354_vm3, %v119_v30, -inf  ;;  %v137_v35 = vsel %vm3377_vm1, %v120_v33, -inf  ;;  %v143_v37 = vmax.f32 %v106_v29, %v139_v32  ;;  %v2864_v39 = vunpack.i.h.bf16 %v2862_v22  ;;  %v2872_v45 = vpop.permute.xlu1 %2871  ;;  %v2867_v47 = vpop.permute.xlu0 %2866 }
  0x87   :  { %v142_v36 = vmax.f32 %v105_v17, %v138_v34  ;;  %v141_v40 = vmax.f32 %v104_v16, %v137_v35  ;;  %v2863_v42 = vunpack.i.l.bf16 %v2862_v22  ;;  %v2859_v43 = vunpack.i.h.bf16 %v2857_v23 }
  0x88   :  { %v2858_v44 = vunpack.i.l.bf16 %v2857_v23  ;;  %v2874_v48 = vunpack.i.h.bf16 %v2872_v45  ;;  %v2873_v49 = vunpack.i.l.bf16 %v2872_v45  ;;  %v2869_v50 = vunpack.i.h.bf16 %v2867_v47 }
  0x89   :  { %v2868_v51 = vunpack.i.l.bf16 %v2867_v47  ;;  %v154_v52 = vsel %vm5097_vm14, %v2863_v42, %v2864_v39  ;;  %v155_v53 = vsel %vm5097_vm14, %v2859_v43, %v2863_v42  ;;  %vm5150_vm10 = vcmp.ge.s32.totalorder %v3257_v21, 1 }
  0x8a   :  { %v156_v54 = vsel %vm5097_vm14, %v2858_v44, %v2859_v43  ;;  %v157_v55 = vsel %vm5097_vm14, %v2864_v39, %v2858_v44  ;;  %v169_v56 = vsel %vm5150_vm10, %v154_v52, -inf  ;;  %vm5151_vm7 = vcmp.ge.s32.totalorder %v3263_v25, 1  ;;  %v2882_v9 = vpop.permute.xlu1 %2881  ;;  %v2877_v10 = vpop.permute.xlu0 %2876 }
  0x8b   :  { %v168_v58 = vsel %vm5151_vm7, %v155_v53, -inf  ;;  %vm5152_vm5 = vcmp.ge.s32.totalorder %v3253_v19, 1  ;;  %vm5153_vm8 = vcmp.ge.s32.totalorder %v3245_v14, 1  ;;  %v173_v61 = vmax.f32 %v144_v31, %v169_v56 }
  0x8c   :  { %v166_v59 = vsel %vm5152_vm5, %v157_v55, -inf  ;;  %v167_v60 = vsel %vm5153_vm8, %v156_v54, -inf  ;;  %v172_v5 = vmax.f32 %v143_v37, %v168_v58  ;;  %v183_v11 = vsel %vm5098_vm12, %v2873_v49, %v2874_v48 }
  0x8d   :  { %v170_v62 = vmax.f32 %v141_v40, %v166_v59  ;;  %v171_v3 = vmax.f32 %v142_v36, %v167_v60  ;;  %v184_v12 = vsel %vm5098_vm12, %v2869_v50, %v2873_v49  ;;  %v185_v16 = vsel %vm5098_vm12, %v2868_v51, %v2869_v50 }
  0x8e   :  { %v186_v17 = vsel %vm5098_vm12, %v2874_v48, %v2868_v51  ;;  %v197_v22 = vsel %vm5100_vm6, %v183_v11, -inf  ;;  %vm5154_vm5 = vcmp.lt.s32.totalorder %v3245_v14, 15  ;;  %vm5155_vm7 = vcmp.lt.s32.totalorder %v3253_v19, 15  ;;  %v2892_v37 = vpop.permute.xlu1 %2891  ;;  %v2887_v39 = vpop.permute.xlu0 %2886 }
  0x8f   :  { %v196_v23 = vsel %vm5154_vm5, %v184_v12, -inf  ;;  %v195_v26 = vsel %vm5155_vm7, %v185_v16, -inf  ;;  %vm5156_vm10 = vcmp.lt.s32.totalorder %v3257_v21, 15  ;;  %vm5157_vm8 = vcmp.ge.s32.totalorder %v3263_v25, 1 }
  0x90   :  { %v198_v27 = vsel %vm5156_vm10, %v186_v17, -inf  ;;  %vm3437_vm14 = vmand %vm5099_vm0, %vm5157_vm8  ;;  %v5158_v29 = vmov 0  ;;  %v201_v30 = vmax.f32 %v172_v5, %v197_v22  ;;  %v199_v31 = vmax.f32 %v170_v62, %v195_v26 }
  0x91   :  { %v5159_v29 = vsel %vm3437_vm14, 4294967295, %v5158_v29  ;;  %v2884_v32 = vunpack.i.h.bf16 %v2882_v9  ;;  %v2883_v33 = vunpack.i.l.bf16 %v2882_v9  ;;  %vm5160_vm5 = vcmp.ge.s32.totalorder %v3253_v19, 1 }
  0x92   :  { %vm5161_vm12 = vcmp.lt.s32.totalorder %v3250_v18, 15  ;;  %v5162_v34 = vmov 0  ;;  %v2879_v35 = vunpack.i.h.bf16 %v2877_v10  ;;  %v2878_v36 = vunpack.i.l.bf16 %v2877_v10  ;;  %v2902_v59 = vpop.permute.xlu1 %2901  ;;  %v2897_v60 = vpop.permute.xlu0 %2896 }
  0x93   :  { %vm3445_vm7 = vmand %vm5161_vm12, %vm5160_vm5  ;;  %v200_v40 = vmax.f32 %v171_v3, %v196_v23  ;;  %vm5164_vm10 = vcmp.ge.s32.totalorder %v3245_v14, 1  ;;  %vm5165_vm8 = vcmp.lt.s32.totalorder %v3243_v13, 15  ;;  %v5166_v42 = vmov 0 }
  0x94   :  { %v5163_v34 = vsel %vm3445_vm7, 4294967295, %v5162_v34  ;;  %vm3453_vm0 = vmand %vm5165_vm8, %vm5164_vm10  ;;  %v202_v43 = vmax.f32 %v173_v61, %v198_v27  ;;  %vm5168_vm6 = vcmp.lt.s32.totalorder %v3238_v8, 113  ;;  %v2894_v45 = vunpack.i.h.bf16 %v2892_v37 }
  0x95   :  { %v5167_v42 = vsel %vm3453_vm0, 4294967295, %v5166_v42  ;;  %v212_v44 = vsel %vm5168_vm6, %v2883_v33, %v2884_v32  ;;  %v2893_v47 = vunpack.i.l.bf16 %v2892_v37  ;;  %v2889_v48 = vunpack.i.h.bf16 %v2887_v39  ;;  %vm5173_vm10 = vmmov %vm5168_vm6 }
  0x96   :  { %vm5169_vm12 = vcmp.ge.s32.totalorder %v3257_v21, 1  ;;  %vm5170_vm5 = vcmp.lt.s32.totalorder %v3255_v20, 15  ;;  %v5171_v49 = vmov 0  ;;  %v234_v50 = vsel %vm3437_vm14, %v212_v44, -inf  ;;  %vm5174_vm8 = vmmov %vm5168_vm6 }
  0x97   :  { %vm3463_vm1 = vmand %vm5170_vm5, %vm5169_vm12  ;;  %v213_v51 = vsel %vm5173_vm10, %v2879_v35, %v2883_v33  ;;  %v214_v52 = vsel %vm5174_vm8, %v2878_v36, %v2879_v35  ;;  %v215_v53 = vsel %vm5168_vm6, %v2884_v32, %v2878_v36  ;;  %vm5175_vm12 = vcmp.lt.s32.totalorder %v3238_v8, 112 }
  0x98   :  { %v5172_v49 = vsel %vm3463_vm1, 4294967295, %v5171_v49  ;;  %v232_v54 = vsel %vm3445_vm7, %v214_v52, -inf  ;;  %v249_v55 = vsel %vm5175_vm12, %v2893_v47, %v2894_v45  ;;  %v2888_v56 = vunpack.i.l.bf16 %v2887_v39  ;;  %vm5176_vm5 = vmmov %vm5175_vm12 }
  0x99   :  { %v233_v58 = vsel %vm3453_vm0, %v213_v51, -inf  ;;  %v250_v62 = vsel %vm5176_vm5, %v2889_v48, %v2893_v47  ;;  %v235_v3 = vsel %vm3463_vm1, %v215_v53, -inf  ;;  %v236_v5 = vmax.f32 %v199_v31, %v232_v54  ;;  %vm5177_vm10 = vmmov %vm5176_vm5 }
  0x9a   :  { %v237_v61 = vmax.f32 %v200_v40, %v233_v58  ;;  %v251_v9 = vsel %vm5177_vm10, %v2888_v56, %v2889_v48  ;;  %v2904_v10 = vunpack.i.h.bf16 %v2902_v59  ;;  %v2903_v11 = vunpack.i.l.bf16 %v2902_v59  ;;  %vm5183_vm7 = vmmov %vm5177_vm10 }
  0x9b   :  { %v2899_v12 = vunpack.i.h.bf16 %v2897_v60  ;;  %vm5178_vm8 = vcmp.lt.s32.totalorder %v3245_v14, 15  ;;  %vm5179_vm6 = vcmp.lt.s32.totalorder %v3243_v13, 15  ;;  %v5180_v16 = vmov 0 }
  0x9c   :  { %vm3491_vm12 = vmand %vm5179_vm6, %vm5178_vm8  ;;  %v2898_v17 = vunpack.i.l.bf16 %v2897_v60  ;;  %v239_v23 = vmax.f32 %v202_v43, %v235_v3  ;;  %v252_v26 = vsel %vm5183_vm7, %v2894_v45, %v2888_v56  ;;  %vm5184_vm10 = vcmp.lt.s32.totalorder %v3257_v21, 15  ;;  %v302_v3 = vld [vmem:[%s5080_s1] sm:$0xff] }
  0x9d   :  { %v5181_v16 = vsel %vm3491_vm12, 4294967295, %v5180_v16  ;;  %vm5182_vm5 = vmmov %vm5179_vm6  ;;  %vm5185_vm14 = vcmp.lt.s32.totalorder %v3255_v20, 15  ;;  %v5186_v27 = vmov 0  ;;  %vm5188_vm8 = vcmp.lt.s32.totalorder %v3238_v8, 111 }
  0x9e   :  { %v262_v22 = vsel %vm5182_vm5, %v250_v62, -inf  ;;  %vm3503_vm1 = vmand %vm5185_vm14, %vm5184_vm10  ;;  %v279_v32 = vsel %vm5188_vm8, %v2899_v12, %v2903_v11  ;;  %vm5190_vm5 = vcmp.lt.s32.totalorder %v3250_v18, 15  ;;  %vm5191_vm7 = vcmp.lt.s32.totalorder %v3253_v19, 15 }
  0x9f   :  { %v5187_v27 = vsel %vm3503_vm1, 4294967295, %v5186_v27  ;;  %v266_v31 = vmax.f32 %v237_v61, %v262_v22  ;;  %vm5189_vm6 = vmmov %vm5185_vm14  ;;  %v261_v35 = vsel %vm5190_vm5, %v251_v9, -inf  ;;  %v5193_v36 = vmov 0 }
  0xa0   :  { %v264_v33 = vsel %vm5189_vm6, %v252_v26, -inf  ;;  %vm5192_vm0 = vmmov %vm5190_vm5  ;;  %v295_v37 = vsel %vm3491_vm12, %v279_v32, -inf  ;;  %v265_v43 = vmax.f32 %v236_v5, %v261_v35  ;;  %vm5196_vm10 = vcmp.lt.s32.totalorder %v3263_v25, 15 }
  0xa1   :  { %vm3517_vm11 = vmand %vm5192_vm0, %vm5191_vm7  ;;  %v268_v39 = vmax.f32 %v239_v23, %v264_v33  ;;  %v5198_v44 = vmov 0  ;;  %v299_v45 = vmax.f32 %v266_v31, %v295_v37  ;;  %v238_v51 = vmax.f32 %v201_v30, %v234_v50 }
  0xa2   :  { %v5194_v36 = vsel %vm3517_vm11, 4294967295, %v5193_v36  ;;  %vm5195_vm14 = vmmov %vm5188_vm8  ;;  %vm5197_vm8 = vcmp.lt.s32.totalorder %v3261_v24, 15 }
  0xa3   :  { %v281_v40 = vsel %vm5195_vm14, %v2904_v10, %v2898_v17  ;;  %vm3529_vm6 = vmand %vm5197_vm8, %vm5196_vm10  ;;  %v2611_v58 = vpack.c.bf16 %v299_v45, %v3204_v1  ;;  %v303_v1 = vld [vmem:[%s5080_s1 + $0x8] sm:$0xff]  ;;  %vm5203_vm10 = vcmp.lt.s32.totalorder %v3238_v8, 1 }
  0xa4   :  { %v5199_v44 = vsel %vm3529_vm6, 4294967295, %v5198_v44  ;;  %v297_v47 = vsel %vm3503_vm1, %v281_v40, -inf  ;;  %vm5200_vm0 = vmmov %vm5195_vm14  ;;  %vm306_vm14 = vcmask 130048  }
  0xa5   :  { %v280_v48 = vsel %vm5200_vm0, %v2898_v17, %v2899_v12  ;;  %v301_v52 = vmax.f32 %v268_v39, %v297_v47  ;;  %vm5201_vm5 = vmmov %vm5197_vm8  ;;  %2612 = vmatprep.subr.bf16.mxu0 %v2611_v58  ;;  %vm5117_vm8 = vmmov 1  }
  0xa6   :  { %v294_v53 = vsel %vm3517_vm11, %v280_v48, -inf  ;;  %v263_v54 = vsel %vm5201_vm5, %v249_v55, -inf  ;;  %vm5202_vm7 = vmmov %vm5200_vm0  ;;  %vm5204_vm0 = vcmp.ge.s32.totalorder %v3257_v21, 1  ;;  %vm5210_vm11 = vcmp.ge.s32.totalorder %v3263_v25, 1 }
  0xa7   :  { %v278_v56 = vsel %vm5202_vm7, %v2903_v11, %v2904_v10  ;;  %v298_v59 = vmax.f32 %v265_v43, %v294_v53  ;;  %v267_v60 = vmax.f32 %v238_v51, %v263_v54  ;;  %v2615_v62 = vpack.c.bf16 %v301_v52, %v3216_v4  ;;  %v305_v51 = vld [vmem:[%s5080_s1 + $0x18] sm:$0xff]  ;;  %vm2626_vm5 = vmpackc.low %vm5117_vm8, %vm5204_vm0 }
  0xa8   :  { %v296_v61 = vsel %vm3529_vm6, %v278_v56, -inf  ;;  %vm5205_vm7 = vcmp.ge.s32.totalorder %v3245_v14, 1  ;;  %vm5208_vm0 = vmmov %vm5203_vm10 }
  0xa9   :  { %v2613_v30 = vpack.c.bf16 %v298_v59, %v3199_v0  ;;  %v300_v50 = vmax.f32 %v267_v60, %v296_v61  ;;  %2616 = vmatprep.subr.bf16.mxu1 %v2615_v62  ;;  %v304_v0 = vld [vmem:[%s5080_s1 + $0x10] sm:$0xff]  ;;  %s3154_s1 = smov 14   ;;  %vm2629_vm6 = vmpackc.low %vm5117_vm8, %vm5210_vm11  ;;  %vm5212_vm11 = vcmp.lt.s32.totalorder %v3238_v8, 127 }
  0xab   :  { %2614 = vmatpush1.bf16.msra.mxu0 %v2613_v30  ;;  %v2617_v55 = vpack.c.bf16 %v300_v50, %v3209_v2 }
  0xad   :  { %2618 = vmatpush1.bf16.msra.mxu1 %v2617_v55 }
  0xae   :  { %2453 = vmatmul.mubr.msk.f32.vlgmr.msra.gmra.mrb[0].mxu0 %vm306_vm14, %v302_v3 }
  0xaf   :  { %389 = vmatprep.mubr.f32.mxu0 %v5127_v6 }
  0xb0   :  { %2457 = vmatmul.mubr.msk.f32.vlgmr.msra.gmra.mrb[0].mxu1 %vm306_vm14, %v302_v3 }
  0xb1   :  { %478 = vmatprep.mubr.f32.mxu1 %v5127_v6 }
  0xb2   :  { %2454 = vmatmul.mubr.msk.f32.gmra.mrb[2].mxu0 %vm306_vm14, %v303_v1 }
  0xb3   :  { %395 = vmatprep.mubr.f32.mxu0 %v5127_v6 }
  0xb4   :  { %2458 = vmatmul.mubr.msk.f32.gmra.mrb[2].mxu1 %vm306_vm14, %v303_v1 }
  0xb5   :  { %484 = vmatprep.mubr.f32.mxu1 %v5127_v6 }
  0xb6   :  { %2455 = vmatmul.mubr.msk.f32.gmra.mrb[4].mxu0 %vm306_vm14, %v304_v0 }
  0xb7   :  { %401 = vmatprep.mubr.f32.mxu0 %v5127_v6 }
  0xb8   :  { %2459 = vmatmul.mubr.msk.f32.gmra.mrb[4].mxu1 %vm306_vm14, %v304_v0 }
  0xb9   :  { %490 = vmatprep.mubr.f32.mxu1 %v5127_v6 }
  0xba   :  { %2456 = vmatmul.mubr.msk.f32.gmra.mrb[6].mxu0 %vm306_vm14, %v305_v51 }
  0xbb   :  { %672 = vmatprep.mubr.f32.mxu0 %v5127_v6 }
  0xbc   :  { %2460 = vmatmul.mubr.msk.f32.gmra.mrb[6].mxu1 %vm306_vm14, %v305_v51  ;;  %vm3752_vm14 = vmpackc.low %vm5117_vm8, %vm5205_vm7  ;;  %vm5211_vm7 = vcmp.ge.s32.totalorder %v3253_v19, 1 }
  0xbd   :  { %743 = vmatprep.mubr.f32.mxu1 %v5127_v6 }
 0x181   :  { %v385_v2 = vpop.f32.mrb[0].mxu0 }
 0x182   :  { %v497_v4 = vmax.f32 %v385_v2, 0.0  ;;  %v387_v5 = vpop.f32.mrb[1].mxu0 }
 0x183   :  { %v474_v9 = vpop.f32.mrb[0].mxu1  ;;  %v498_v10 = vmax.f32 %v387_v5, 0.0 }
 0x184   :  { %v499_v11 = vmax.f32 %v474_v9, 0.0  ;;  %v476_v12 = vpop.f32.mrb[1].mxu1  ;;  %513 = vst [vmem:[%s5081_s4] sm:$0xff] %v497_v4 }
 0x185   :  { %v500_v17 = vmax.f32 %v476_v12, 0.0  ;;  %514 = vst [vmem:[%s5081_s4 + $0x8] sm:$0xff] %v498_v10  ;;  %v391_v22 = vpop.f32.mrb[2].mxu0 }
 0x186   :  { %515 = vst [vmem:[%s5081_s4 + $0x10] sm:$0xff] %v499_v11  ;;  %v3579_v23 = vmax.f32 %v391_v22, 0.0  ;;  %v393_v26 = vpop.f32.mrb[3].mxu0 }
 0x187   :  { %516 = vst [vmem:[%s5081_s4 + $0x18] sm:$0xff] %v500_v17  ;;  %v480_v31 = vpop.f32.mrb[2].mxu1  ;;  %v3595_v47 = vmax.f32 %v393_v26, 0.0 }
 0x188   :  { %v3584_v32 = vmax.f32 %v480_v31, 0.0  ;;  %v482_v33 = vpop.f32.mrb[3].mxu1  ;;  %586 = vrot.lane.b32.xlu0 %v3579_v23, %s3149_s26 }
 0x189   :  { %v3588_v35 = vmax.f32 %v482_v33, 0.0  ;;  %v397_v37 = vpop.f32.mrb[4].mxu0  ;;  %v2905_v48 = vpack.i.bf16 %v3595_v47, %v3579_v23 }
 0x18a   :  { %v399_v39 = vpop.f32.mrb[5].mxu0  ;;  %v3631_v52 = vmax.f32 %v397_v37, 0.0 }
 0x18b   :  { %v2910_v40 = vpack.i.bf16 %v3588_v35, %v3584_v32  ;;  %v486_v43 = vpop.f32.mrb[4].mxu1  ;;  %v3666_v58 = vmax.f32 %v399_v39, 0.0 }
 0x18c   :  { %590 = vrot.lane.b32.xlu0 %v3584_v32, %s3149_s26  ;;  %v488_v45 = vpop.f32.mrb[5].mxu1  ;;  %v3635_v53 = vmax.f32 %v486_v43, 0.0 }
 0x18d   :  { %2911 = vrot.lane.b32.xlu1 %v2910_v40, %s3148_s0  ;;  %v3637_v54 = vmax.f32 %v488_v45, 0.0  ;;  %v3673_v59 = vpack.i.bf16 %v3666_v58, %v3631_v52 }
 0x18f   :  { %v3644_v56 = vpack.i.bf16 %v3637_v54, %v3635_v53 }
 0x190   :  { %553 = vrot.lane.b32.xlu0 %v3579_v23, %s3147_s25 }
 0x191   :  { %588 = vrot.lane.b32.xlu1 %v3595_v47, %s3149_s26 }
 0x194   :  { %557 = vrot.lane.b32.xlu0 %v3584_v32, %s3147_s25 }
 0x195   :  { %592 = vrot.lane.b32.xlu1 %v3588_v35, %s3149_s26 }
 0x198   :  { %927 = vrot.lane.b32.xlu0 %v3579_v23, %s3152_s29 }
 0x199   :  { %2921 = vrot.lane.b32.xlu1 %v2910_v40, %s3146_s24 }
 0x19c   :  { %931 = vrot.lane.b32.xlu0 %v3584_v32, %s3152_s29 }
 0x19d   :  { %2931 = vrot.lane.b32.xlu1 %v2910_v40, %s3145_s23 }
 0x1a0   :  { %2906 = vrot.lane.b32.xlu0 %v2905_v48, %s3148_s0 }
 0x1a1   :  { %555 = vrot.lane.b32.xlu1 %v3595_v47, %s3147_s25 }
 0x1a4   :  { %2916 = vrot.lane.b32.xlu0 %v2905_v48, %s3146_s24 }
 0x1a5   :  { %559 = vrot.lane.b32.xlu1 %v3588_v35, %s3147_s25 }
 0x1a8   :  { %2926 = vrot.lane.b32.xlu0 %v2905_v48, %s3145_s23 }
 0x1a9   :  { %2941 = vrot.lane.b32.xlu1 %v2910_v40, %s3150_s27 }
 0x1ac   :  { %2936 = vrot.lane.b32.xlu0 %v2905_v48, %s3150_s27 }
 0x1ad   :  { %2951 = vrot.lane.b32.xlu1 %v2910_v40, %s3151_s28 }
 0x1b0   :  { %2946 = vrot.lane.b32.xlu0 %v2905_v48, %s3151_s28 }
 0x1b1   :  { %929 = vrot.lane.b32.xlu1 %v3595_v47, %s3152_s29 }
 0x1b4   :  { %1333 = vrot.lane.b32.xlu0 %v3631_v52, %s3154_s1 }
 0x1b5   :  { %933 = vrot.lane.b32.xlu1 %v3588_v35, %s3152_s29 }
 0x1b8   :  { %1337 = vrot.lane.b32.xlu0 %v3635_v53, %s3154_s1 }
 0x1b9   :  { %2961 = vrot.lane.b32.xlu1 %v3644_v56, %s3155_s20 }
 0x1bc   :  { %1222 = vrot.lane.b32.xlu0 %v3631_v52, %s3156_s21 }
 0x1bd   :  { %2971 = vrot.lane.b32.xlu1 %v3644_v56, %s3146_s24 }
 0x1c0   :  { %1226 = vrot.lane.b32.xlu0 %v3635_v53, %s3156_s21 }
 0x1c1   :  { %2981 = vrot.lane.b32.xlu1 %v3644_v56, %s3145_s23 }
 0x1c4   :  { %1712 = vrot.lane.b32.xlu0 %v3631_v52, %s3157_s22 }
 0x1c5   :  { %2991 = vrot.lane.b32.xlu1 %v3644_v56, %s3147_s25 }
 0x1c8   :  { %1716 = vrot.lane.b32.xlu0 %v3635_v53, %s3157_s22 }
 0x1c9   :  { %3001 = vrot.lane.b32.xlu1 %v3644_v56, %s3158_s30 }
 0x1cc   :  { %1965 = vrot.lane.b32.xlu0 %v3631_v52, %s3159_s5 }
 0x1cd   :  { %3011 = vrot.lane.b32.xlu1 %v3644_v56, %s3160_s6 }
 0x1d0   :  { %1969 = vrot.lane.b32.xlu0 %v3635_v53, %s3159_s5 }
 0x1d1   :  { %1335 = vrot.lane.b32.xlu1 %v3666_v58, %s3154_s1 }
 0x1d4   :  { %2956 = vrot.lane.b32.xlu0 %v3673_v59, %s3155_s20 }
 0x1d5   :  { %1339 = vrot.lane.b32.xlu1 %v3637_v54, %s3154_s1 }
 0x1d8   :  { %2966 = vrot.lane.b32.xlu0 %v3673_v59, %s3146_s24  ;;  %s3163_s24 = smov 2  }
 0x1d9   :  { %3021 = vrot.lane.b32.xlu1 %v3644_v56, %s3161_s7 }
 0x1dc   :  { %2976 = vrot.lane.b32.xlu0 %v3673_v59, %s3145_s23  ;;  %s3164_s23 = smov 114  }
 0x1dd   :  { %3031 = vrot.lane.b32.xlu1 %v3644_v56, %s3162_s8 }
 0x1e0   :  { %2986 = vrot.lane.b32.xlu0 %v3673_v59, %s3147_s25  ;;  %s3166_s25 = smov 98  }
 0x1e1   :  { %1224 = vrot.lane.b32.xlu1 %v3666_v58, %s3156_s21 }
 0x1e4   :  { %2996 = vrot.lane.b32.xlu0 %v3673_v59, %s3158_s30 }
 0x1e5   :  { %1228 = vrot.lane.b32.xlu1 %v3637_v54, %s3156_s21 }
 0x1e8   :  { %3006 = vrot.lane.b32.xlu0 %v3673_v59, %s3160_s6 }
 0x1e9   :  { %3041 = vrot.lane.b32.xlu1 %v3644_v56, %s3163_s24 }
 0x1ec   :  { %3016 = vrot.lane.b32.xlu0 %v3673_v59, %s3161_s7 }
 0x1ed   :  { %3051 = vrot.lane.b32.xlu1 %v3644_v56, %s3148_s0 }
 0x1f0   :  { %3026 = vrot.lane.b32.xlu0 %v3673_v59, %s3162_s8 }
 0x1f1   :  { %3061 = vrot.lane.b32.xlu1 %v3644_v56, %s3149_s26 }
 0x1f4   :  { %3036 = vrot.lane.b32.xlu0 %v3673_v59, %s3163_s24 }
 0x1f5   :  { %1714 = vrot.lane.b32.xlu1 %v3666_v58, %s3157_s22 }
 0x1f8   :  { %3046 = vrot.lane.b32.xlu0 %v3673_v59, %s3148_s0  ;;  %s3167_s0 = smov 97  }
 0x1f9   :  { %1718 = vrot.lane.b32.xlu1 %v3637_v54, %s3157_s22 }
 0x1fa   :  { %v3705_v60 = vpop.permute.xlu0 %586 }
 0x1fc   :  { %3056 = vrot.lane.b32.xlu0 %v3673_v59, %s3149_s26  ;;  %s3168_s26 = smov 96  }
 0x1fd   :  { %3071 = vrot.lane.b32.xlu1 %v3644_v56, %s3164_s23 }
 0x1fe   :  { %v3710_v61 = vpop.permute.xlu0 %590 }
 0x1ff   :  { %v2912_v62 = vpop.permute.xlu1 %2911 }
 0x200   :  { %v2914_v30 = vunpack.i.h.bf16 %v2912_v62  ;;  %v2913_v50 = vunpack.i.l.bf16 %v2912_v62  ;;  %3066 = vrot.lane.b32.xlu0 %v3673_v59, %s3164_s23 }
 0x201   :  { %3081 = vrot.lane.b32.xlu1 %v3644_v56, %s3150_s27 }
 0x202   :  { %v578_v55 = vsel %vm5203_vm10, %v2913_v50, %v2914_v30  ;;  %v3717_v3 = vpop.permute.xlu0 %553 }
 0x203   :  { %v2625_v1 = vpack.c.bf16 %v3588_v35, %v578_v55  ;;  %v589_v0 = vpop.permute.xlu1 %588 }
 0x204   :  { %3076 = vrot.lane.b32.xlu0 %v3673_v59, %s3150_s27 }
 0x205   :  { %2627 = vmatprep.subr.msk.bf16.mxu1 %vm2626_vm5, %v2625_v1  ;;  %3091 = vrot.lane.b32.xlu1 %v3644_v56, %s3151_s28  ;;  %vm5209_vm5 = vmmov %vm5208_vm0 }
 0x206   :  { %v3727_v2 = vpop.permute.xlu0 %557 }
 0x207   :  { %v593_v4 = vpop.permute.xlu1 %592 }
 0x208   :  { %3086 = vrot.lane.b32.xlu0 %v3673_v59, %s3151_s28 }
 0x209   :  { %3101 = vrot.lane.b32.xlu1 %v3644_v56, %s3152_s29 }
 0x20a   :  { %v3733_v5 = vpop.permute.xlu0 %927 }
 0x20b   :  { %v3735_v9 = vpop.permute.xlu1 %2921 }
 0x20c   :  { %3096 = vrot.lane.b32.xlu0 %v3673_v59, %s3152_s29  ;;  %v2924_v62 = vunpack.i.h.bf16 %v3735_v9  ;;  %s3169_s29 = smov 95  }
 0x20d   :  { %1967 = vrot.lane.b32.xlu1 %v3666_v58, %s3159_s5 }
 0x20e   :  { %v3741_v10 = vpop.permute.xlu0 %931 }
 0x20f   :  { %v2932_v11 = vpop.permute.xlu1 %2931 }
 0x210   :  { %3106 = vrot.lane.b32.xlu0 %v3673_v59, %s3166_s25  ;;  %v2934_v31 = vunpack.i.h.bf16 %v2932_v11  ;;  %v2933_v35 = vunpack.i.l.bf16 %v2932_v11 }
 0x211   :  { %1971 = vrot.lane.b32.xlu1 %v3637_v54, %s3159_s5 }
 0x212   :  { %v2907_v12 = vpop.permute.xlu0 %2906 }
 0x213   :  { %v3746_v17 = vpop.permute.xlu1 %555  ;;  %v2909_v22 = vunpack.i.h.bf16 %v2907_v12  ;;  %v2908_v26 = vunpack.i.l.bf16 %v2907_v12 }
 0x214   :  { %3116 = vrot.lane.b32.xlu0 %v3673_v59, %s3167_s0 }
 0x215   :  { %v579_v37 = vsel %vm5203_vm10, %v2909_v22, %v2913_v50  ;;  %v580_v39 = vsel %vm5208_vm0, %v2908_v26, %v2909_v22  ;;  %v581_v40 = vsel %vm5209_vm5, %v2914_v30, %v2908_v26  ;;  %3111 = vrot.lane.b32.xlu1 %v3644_v56, %s3166_s25  ;;  %v2923_v50 = vunpack.i.l.bf16 %v3735_v9  ;;  %vm2623_vm10 = vmpackc.low %vm5117_vm8, %vm5211_vm7 }
 0x216   :  { %v2628_v43 = vpack.c.bf16 %v3584_v32, %v579_v37  ;;  %v2619_v45 = vpack.c.bf16 %v3595_v47, %v580_v39  ;;  %v2622_v48 = vpack.c.bf16 %v3579_v23, %v581_v40  ;;  %v2917_v51 = vpop.permute.xlu0 %2916  ;;  %v597_v23 = vsel %vm5212_vm11, %v593_v4, %v3705_v60  ;;  %vm5214_vm5 = vmmov %vm5212_vm11 }
 0x217   :  { %v3771_v55 = vpop.permute.xlu1 %559  ;;  %v2919_v30 = vunpack.i.h.bf16 %v2917_v51  ;;  %v2918_v1 = vunpack.i.l.bf16 %v2917_v51  ;;  %vm5213_vm0 = vcmp.lt.s32.totalorder %v3238_v8, 16  ;;  %v595_v47 = vsel %vm5214_vm5, %v589_v0, %v3710_v61  ;;  %vm5216_vm7 = vmmov %vm5214_vm5 }
 0x218   :  { %2621 = vmatprep.subr.msk.bf16.mxu0 %vm3752_vm14, %v2619_v45  ;;  %2630 = vmatpush1.bf16.msk.msra.mxu1 %vm2629_vm6, %v2628_v43  ;;  %v545_v32 = vsel %vm5213_vm0, %v2933_v35, %v2934_v31  ;;  %vm5215_vm14 = vcmp.lt.s32.totalorder %v3257_v21, 15  ;;  %v594_v11 = vsel %vm5216_vm7, %v3710_v61, %v593_v4  ;;  %vm5217_vm11 = vcmp.lt.s32.totalorder %v3238_v8, 17  ;;  %v2461_v43 = vld [vmem:[%s5082_s2 + $0x8] sm:$0xff] }
 0x219   :  { %3121 = vrot.lane.b32.xlu1 %v3644_v56, %s3167_s0  ;;  %3126 = vrot.lane.b32.xlu0 %v3673_v59, %s3168_s26  ;;  %v529_v12 = vsel %vm5217_vm11, %v2923_v50, %v2924_v62  ;;  %vm5218_vm0 = vcmp.lt.s32.totalorder %v3245_v14, 15  ;;  %vm5233_vm6 = vcmp.lt.s32.totalorder %v3238_v8, 17 }
 0x21a   :  { %2624 = vmatpush1.bf16.msk.msra.mxu0 %vm2623_vm10, %v2622_v48  ;;  %2469 = vmatprep.subr.msk.mxu1 %vm5215_vm14, %v597_v23  ;;  %v2927_v9 = vpop.permute.xlu0 %2926  ;;  %vm5219_vm10 = vcmp.ge.s32.totalorder %v3255_v20, 1  ;;  %vm5222_vm14 = vmmov %vm5216_vm7  ;;  %v2637_v4 = vpack.c.bf16 %v545_v32, %v529_v12  ;;  %v532_v51 = vsel %vm5233_vm6, %v2924_v62, %v2918_v1  ;;  %vm5236_vm6 = vcmp.ge.s32.totalorder %v3250_v18, 1 }
 0x21b   :  { %v3795_v22 = vpop.permute.xlu1 %2941  ;;  %v2929_v26 = vunpack.i.h.bf16 %v2927_v9  ;;  %v2928_v33 = vunpack.i.l.bf16 %v2927_v9  ;;  %2464 = vmatprep.subr.msk.mxu0 %vm5218_vm0, %v595_v47  ;;  %vm3803_vm5 = vmpackc.low %vm5219_vm10, %vm3302_vm15  ;;  %v596_v61 = vsel %vm5222_vm14, %v3705_v60, %v589_v0  ;;  %vm5225_vm0 = vcmp.lt.s32.totalorder %v3263_v25, 15 }
 0x21c   :  { %vm5223_vm7 = vmmov %vm5217_vm11  ;;  %2470 = vmatpush1.msk.msra.mxu1 %vm5225_vm0, %v594_v11  ;;  %vm5226_vm10 = vcmp.ge.s32.totalorder %v3243_v13, 1  ;;  %vm5229_vm14 = vcmp.lt.s32.totalorder %v3238_v8, 16  ;;  %vm5232_vm0 = vcmp.ge.s32.totalorder %v3261_v24, 1  ;;  %v2944_v11 = vunpack.i.h.bf16 %v3795_v22 }
 0x21d   :  { %v530_v39 = vsel %vm5223_vm7, %v2919_v30, %v2923_v50  ;;  %vm5224_vm11 = vmmov %vm5223_vm7  ;;  %v546_v0 = vsel %vm5229_vm14, %v2929_v26, %v2933_v35  ;;  %3131 = vrot.lane.b32.xlu1 %v3644_v56, %s3168_s26  ;;  %3136 = vrot.lane.b32.xlu0 %v3673_v59, %s3169_s29  ;;  %v2943_v12 = vunpack.i.l.bf16 %v3795_v22 }
 0x21e   :  { %v531_v40 = vsel %vm5224_vm11, %v2918_v1, %v2919_v30  ;;  %vm3823_vm8 = vmpackc.low %vm5226_vm10, %vm3269_vm4  ;;  %v2640_v50 = vpack.c.bf16 %v546_v0, %v530_v39  ;;  %v2937_v30 = vpop.permute.xlu0 %2936  ;;  %2639 = vmatprep.subr.msk.bf16.mxu1 %vm3803_vm5, %v2637_v4 }
 0x21f   :  { %vm5230_vm7 = vmmov %vm5229_vm14  ;;  %vm5234_vm14 = vcmp.lt.s32.totalorder %v3253_v19, 15  ;;  %v2952_v23 = vpop.permute.xlu1 %2951  ;;  %v2939_v47 = vunpack.i.h.bf16 %v2937_v30  ;;  %v2938_v9 = vunpack.i.l.bf16 %v2937_v30 }
 0x220   :  { %v547_v45 = vsel %vm5230_vm7, %v2928_v33, %v2929_v26  ;;  %vm5231_vm11 = vmmov %vm5230_vm7  ;;  %2465 = vmatpush1.msk.msra.mxu0 %vm5234_vm14, %v596_v61  ;;  %vm5235_vm7 = vcmask 195584   ;;  %v2954_v59 = vunpack.i.h.bf16 %v2952_v23  ;;  %v2953_v32 = vunpack.i.l.bf16 %v2952_v23 }
 0x221   :  { %v548_v48 = vsel %vm5231_vm11, %v2934_v31, %v2928_v33  ;;  %vm2641_vm10 = vmpackc.low %vm5232_vm0, %vm3317_vm9  ;;  %v2631_v35 = vpack.c.bf16 %v547_v45, %v531_v40  ;;  %2471 = vmatmul.mubr.msk.f32.vlgmr.msra.gmra.mrb[8].mxu1 %vm5235_vm7, %v2461_v43  ;;  %vm5237_vm0 = vcmp.lt.s32.totalorder %v3238_v8, 15  ;;  %3141 = vrot.lane.b32.xlu1 %v3644_v56, %s3169_s29 }
 0x222   :  { %v2634_v31 = vpack.c.bf16 %v548_v48, %v532_v51  ;;  %2642 = vmatpush1.bf16.msk.msra.mxu1 %vm2641_vm10, %v2640_v50  ;;  %vm2635_vm11 = vmpackc.low %vm5236_vm6, %vm3291_vm13  ;;  %v561_v62 = vsel %vm5237_vm0, %v3727_v2, %v3771_v55  ;;  %2261 = vrot.lane.b32.xlu0 %v3631_v52, %s3170_s9  ;;  %v2947_v26 = vpop.permute.xlu0 %2946  ;;  %vm5243_vm6 = vcmp.lt.s32.totalorder %v3238_v8, 113 }
 0x223   :  { %2633 = vmatprep.subr.msk.bf16.mxu0 %vm3823_vm8, %v2631_v35  ;;  %vm5238_vm8 = vmmov %vm5237_vm0  ;;  %2483 = vmatprep.subr.msk.mxu1 %vm3342_vm2, %v561_v62  ;;  %v930_v33 = vpop.permute.xlu1 %929  ;;  %v2949_v37 = vunpack.i.h.bf16 %v2947_v26  ;;  %v2948_v22 = vunpack.i.l.bf16 %v2947_v26  ;;  %v904_v4 = vsel %vm5243_vm6, %v2939_v47, %v2943_v12 }
 0x224   :  { %v562_v1 = vsel %vm5238_vm8, %v3746_v17, %v3727_v2  ;;  %vm5239_vm5 = vmmov %vm5235_vm7  ;;  %vm5242_vm7 = vcmp.lt.s32.totalorder %v3238_v8, 112  ;;  %vm5245_vm8 = vnez %v5146_v7  ;;  %888 = vmatprep.mubr.f32.mxu1 %v5127_v6 }
 0x225   :  { %2466 = vmatmul.mubr.msk.f32.vlgmr.msra.gmra.mrb[8].mxu0 %vm5239_vm5, %v2461_v43  ;;  %vm5240_vm10 = vmmov %vm5237_vm0  ;;  %v919_v61 = vsel %vm5242_vm7, %v2953_v32, %v2954_v59  ;;  %vm5247_vm5 = vcmp.lt.s32.totalorder %v3243_v13, 15  ;;  %v921_v40 = vsel %vm5242_vm7, %v2948_v22, %v2949_v37  ;;  %2263 = vrot.lane.b32.xlu1 %v3666_v58, %s3170_s9 }
 0x226   :  { %v563_v56 = vsel %vm5240_vm10, %v3717_v3, %v3746_v17  ;;  %vm5241_vm14 = vmmov %vm5237_vm0  ;;  %2636 = vmatpush1.bf16.msk.msra.mxu0 %vm2635_vm11, %v2634_v31  ;;  %817 = vmatprep.mubr.f32.mxu0 %v5127_v6  ;;  %vm5246_vm11 = vnez %v5167_v42  ;;  %v3916_v51 = vpop.permute.xlu0 %1333 }
 0x227   :  { %v564_v2 = vsel %vm5241_vm14, %v3771_v55, %v3717_v3  ;;  %vm5244_vm0 = vmmov %vm5243_vm6  ;;  %2476 = vmatprep.subr.msk.mxu0 %vm3354_vm3, %v563_v56  ;;  %2484 = vmatpush1.msk.msra.mxu1 %vm5245_vm8, %v562_v1  ;;  %v569_v55 = vld [vmem:[%s5082_s2] sm:$0xff]  ;;  %vm5254_vm8 = vcmp.lt.s32.totalorder %v3238_v8, 113  ;;  %v934_v30 = vpop.permute.xlu1 %933 }
 0x228   :  { %v906_v17 = vsel %vm5244_vm0, %v2944_v11, %v2938_v9  ;;  %vm3891_vm10 = vmpackc.low %vm5247_vm5, %vm5246_vm11  ;;  %2265 = vrot.lane.b32.xlu0 %v3635_v53, %s3170_s9  ;;  %vm5252_vm0 = vnez %v5172_v49  ;;  %vm5253_vm5 = vcmp.lt.s32.totalorder %v3255_v20, 15  ;;  %v903_v60 = vsel %vm5254_vm8, %v2943_v12, %v2944_v11 }
 0x229   :  { %vm5250_vm14 = vmmov %vm5242_vm7  ;;  %v2652_v35 = vpack.c.bf16 %v919_v61, %v903_v60  ;;  %2267 = vrot.lane.b32.xlu1 %v3637_v54, %s3170_s9 }
 0x22a   :  { %v920_v39 = vsel %vm5250_vm14, %v2949_v37, %v2953_v32  ;;  %vm5251_vm6 = vmmov %vm5242_vm7  ;;  %vm5256_vm7 = vnez %v5159_v29  ;;  %v3940_v23 = vpop.permute.xlu0 %1337 }
 0x22b   :  { %v922_v43 = vsel %vm5251_vm6, %v2954_v59, %v2948_v22  ;;  %vm2650_vm11 = vmpackc.low %vm5253_vm5, %vm5252_vm0  ;;  %v2643_v45 = vpack.c.bf16 %v920_v39, %v904_v4  ;;  %vm5257_vm6 = vcmp.lt.s32.totalorder %v3261_v24, 15  ;;  %vm5258_vm5 = vnez %v5149_v15  ;;  %v3945_v32 = vpop.permute.xlu1 %2961 }
 0x22c   :  { %vm5255_vm14 = vmmov %vm5254_vm8  ;;  %v2649_v48 = vpack.c.bf16 %v922_v43, %v906_v17  ;;  %2477 = vmatpush1.msk.msra.mxu0 %vm5258_vm5, %v564_v2  ;;  %vm5259_vm8 = vcmask 195584   ;;  %vm5261_vm0 = vcmp.lt.s32.totalorder %v3250_v18, 15  ;;  %v2963_v1 = vunpack.i.l.bf16 %v3945_v32 }
 0x22d   :  { %v905_v0 = vsel %vm5255_vm14, %v2938_v9, %v2939_v47  ;;  %vm2653_vm3 = vmpackc.low %vm5257_vm6, %vm5256_vm7  ;;  %2485 = vmatmul.mubr.msk.f32.vlgmr.msra.gmra.mrb[8].mxu1 %vm5259_vm8, %v569_v55  ;;  %2645 = vmatprep.subr.msk.bf16.mxu0 %vm3891_vm10, %v2643_v45  ;;  %vm5260_vm14 = vnez %v5163_v34  ;;  %vm5262_vm6 = vcmp.lt.s32.totalorder %v3238_v8, 111  ;;  %v2486_v9 = vld [vmem:[%s5082_s2 + $0x10] sm:$0xff] }
 0x22e   :  { %v2646_v50 = vpack.c.bf16 %v921_v40, %v905_v0  ;;  %2651 = vmatprep.subr.msk.bf16.mxu1 %vm2650_vm11, %v2649_v48  ;;  %vm2647_vm2 = vmpackc.low %vm5261_vm0, %vm5260_vm14  ;;  %v938_v31 = vsel %vm5262_vm6, %v934_v30, %v3733_v5  ;;  %1083 = vmatprep.mubr.f32.mxu1 %v5127_v6  ;;  %vm5266_vm0 = vnez %v5199_v44  ;;  %v3965_v11 = vpop.permute.xlu0 %1222  ;;  %vm5290_vm14 = vcmp.ge.s32.totalorder %v3243_v13, 1 }
 0x22f   :  { %2654 = vmatpush1.bf16.msk.msra.mxu1 %vm2653_vm3, %v2652_v35  ;;  %vm5263_vm7 = vmmov %vm5259_vm8  ;;  %vm5124_vm3 = vcmp.ge.s32.totalorder %v3257_v21, 2  ;;  %v2972_v12 = vpop.permute.xlu1 %2971  ;;  %vm5268_vm8 = vnez %v5194_v36 }
 0x230   :  { %2478 = vmatmul.mubr.msk.f32.vlgmr.msra.gmra.mrb[8].mxu0 %vm5263_vm7, %v569_v55  ;;  %2498 = vmatprep.subr.msk.mxu1 %vm3503_vm1, %v938_v31  ;;  %vm5264_vm11 = vmmov %vm5262_vm6  ;;  %vm1264_vm7 = vcmp.lt.s32.totalorder %v3238_v8, 18  ;;  %v2973_v26 = vunpack.i.l.bf16 %v2972_v12 }
 0x231   :  { %v936_v59 = vsel %vm5264_vm11, %v930_v33, %v3741_v10  ;;  %2648 = vmatpush1.bf16.msk.msra.mxu0 %vm2647_vm2, %v2646_v50  ;;  %vm5265_vm10 = vmmov %vm5262_vm6  ;;  %1012 = vmatprep.mubr.f32.mxu0 %v5127_v6 }
 0x232   :  { %v935_v47 = vsel %vm5265_vm10, %v3741_v10, %v934_v30  ;;  %2491 = vmatprep.subr.msk.mxu0 %vm3491_vm12, %v936_v59  ;;  %vm5267_vm2 = vmmov %vm5262_vm6  ;;  %v2964_v10 = vunpack.i.h.bf16 %v3945_v32  ;;  %vm5269_vm6 = vcmp.ge.s32.totalorder %v3255_v20, 1  ;;  %vm5270_vm10 = vcmask 195584  }
 0x233   :  { %2499 = vmatpush1.msk.msra.mxu1 %vm5266_vm0, %v935_v47  ;;  %v937_v62 = vsel %vm5267_vm2, %v3733_v5, %v930_v33  ;;  %vm1272_vm11 = vmand %vm5269_vm6, %vm5124_vm3  ;;  %v2974_v5 = vunpack.i.h.bf16 %v2972_v12  ;;  %vm5271_vm2 = vcmp.lt.s32.totalorder %v3238_v8, 17  ;;  %v3980_v33 = vpop.permute.xlu0 %1226  ;;  %v3985_v22 = vpop.permute.xlu1 %2981  ;;  %vm5273_vm6 = vcmp.ge.s32.totalorder %v3243_v13, 1 }
 0x234   :  { %v1265_v56 = vsel %vm1264_vm7, %v2963_v1, %v2964_v10  ;;  %vm2668_vm0 = vmpackc.low %vm3302_vm15, %vm1272_vm11  ;;  %vm5121_vm15 = vcmp.ge.s32.totalorder %v3245_v14, 2  ;;  %v2984_v59 = vunpack.i.h.bf16 %v3985_v22  ;;  %v2983_v32 = vunpack.i.l.bf16 %v3985_v22 }
 0x235   :  { %2492 = vmatpush1.msk.msra.mxu0 %vm5268_vm8, %v937_v62  ;;  %2500 = vmatmul.mubr.msk.f32.vlgmr.msra.gmra.mrb[8].mxu1 %vm5270_vm10, %v2486_v9  ;;  %v1293_v2 = vsel %vm5271_vm2, %v2973_v26, %v2974_v5  ;;  %vm5272_vm8 = vmmov %vm5270_vm10  ;;  %vm5276_vm10 = vcmp.ge.s32.totalorder %v3261_v24, 1  ;;  %v5285_v22 = vmov 0 }
 0x236   :  { %1503 = vmatprep.mubr.f32.mxu1 %v5127_v6  ;;  %v2667_v37 = vpack.c.bf16 %v1293_v2, %v1265_v56  ;;  %vm4011_vm11 = vmand %vm5273_vm6, %vm5121_vm15  ;;  %vm5279_vm6 = vcmp.ge.s32.totalorder %v3250_v18, 1 }
 0x237   :  { %v3988_v61 = vpop.permute.xlu0 %1712  ;;  %v3990_v4 = vpop.permute.xlu1 %2991 }
 0x238   :  { %2493 = vmatmul.mubr.msk.f32.vlgmr.msra.gmra.mrb[8].mxu0 %vm5272_vm8, %v2486_v9  ;;  %2669 = vmatprep.subr.msk.bf16.mxu1 %vm2668_vm0, %v2667_v37  ;;  %vm5122_vm0 = vcmp.ge.s32.totalorder %v3263_v25, 2  ;;  %vm5123_vm8 = vcmp.ge.s32.totalorder %v3253_v19, 2  ;;  %v2994_v48 = vunpack.i.h.bf16 %v3990_v4  ;;  %v2993_v35 = vunpack.i.l.bf16 %v3990_v4 }
 0x239   :  { %1432 = vmatprep.mubr.f32.mxu0 %v5127_v6  ;;  %vm4021_vm2 = vmand %vm5276_vm10, %vm5122_vm0  ;;  %vm5282_vm0 = vcmp.lt.s32.totalorder %v3238_v8, 15 }
 0x23a   :  { %vm4031_vm15 = vmand %vm5279_vm6, %vm5123_vm8  ;;  %v1325_v56 = vsel %vm5282_vm0, %v2993_v35, %v2994_v48  ;;  %vm5283_vm6 = vcmp.ge.s32.totalorder %v3255_v20, 1  ;;  %vm5284_vm8 = vnez %v5142_v57  ;;  %vm5287_vm0 = vcmp.lt.s32.totalorder %v3238_v8, 17 }
 0x23b   :  { %v3992_v17 = vpop.permute.xlu0 %1716  ;;  %v3994_v3 = vpop.permute.xlu1 %3001  ;;  %vm4068_vm3 = vmpackc.low %vm5284_vm8, %vm5283_vm6  ;;  %vm5291_vm8 = vnez %v5144_v63 }
 0x23c   :  { %v5286_v22 = vsel %vm4068_vm3, 4294967295, %v5285_v22  ;;  %vm5288_vm1 = vmmov %vm5287_vm0 }
 0x23d   :  { %vm5289_vm12 = vmmov %vm5287_vm0 }
 0x23e   :  { %vm4085_vm6 = vmpackc.low %vm5291_vm8, %vm5290_vm14 }
 0x23f   :  { %v3996_v55 = vpop.permute.xlu0 %1965  ;;  %v3998_v41 = vpop.permute.xlu1 %3011 }
 0x240   :  { %v3013_v31 = vunpack.i.l.bf16 %v3998_v41  ;;  %v5341_v4 = vunpack.i.h.bf16 %v3998_v41 }
 0x243   :  { %v4000_v39 = vpop.permute.xlu0 %1969  ;;  %v4002_v40 = vpop.permute.xlu1 %1335 }
 0x247   :  { %v2957_v43 = vpop.permute.xlu0 %2956  ;;  %v4015_v0 = vpop.permute.xlu1 %1339 }
 0x248   :  { %v2959_v50 = vunpack.i.h.bf16 %v2957_v43  ;;  %v2958_v30 = vunpack.i.l.bf16 %v2957_v43 }
 0x24a   :  { %v1266_v2 = vsel %vm1264_vm7, %v2959_v50, %v2963_v1  ;;  %v1267_v37 = vsel %vm1264_vm7, %v2958_v30, %v2959_v50  ;;  %v1268_v43 = vsel %vm1264_vm7, %v2964_v10, %v2958_v30  ;;  %vm5294_vm7 = vnez %v5146_v7 }
 0x24b   :  { %v2967_v47 = vpop.permute.xlu0 %2966  ;;  %v4046_v9 = vpop.permute.xlu1 %3021  ;;  %vm4093_vm3 = vmpackc.low %vm5294_vm7, %vm5276_vm10  ;;  %v5295_v10 = vmov 0  ;;  %vm5301_vm10 = vcmp.lt.s32.totalorder %v3257_v21, 14  ;;  %vm5305_vm7 = vcmp.lt.s32.totalorder %v3245_v14, 14 }
 0x24c   :  { %v2969_v62 = vunpack.i.h.bf16 %v2967_v47  ;;  %v2968_v12 = vunpack.i.l.bf16 %v2967_v47  ;;  %v5296_v10 = vsel %vm4093_vm3, 4294967295, %v5295_v10 }
 0x24e   :  { %v1294_v47 = vsel %vm5287_vm0, %v2969_v62, %v2973_v26  ;;  %v1295_v1 = vsel %vm5288_vm1, %v2968_v12, %v2969_v62  ;;  %v1296_v50 = vsel %vm5289_vm12, %v2974_v5, %v2968_v12  ;;  %vm5297_vm1 = vcmp.lt.s32.totalorder %v3238_v8, 16 }
 0x24f   :  { %v1309_v26 = vsel %vm5297_vm1, %v2983_v32, %v2984_v59  ;;  %v2655_v5 = vpack.c.bf16 %v1295_v1, %v1267_v37  ;;  %v2658_v30 = vpack.c.bf16 %v1296_v50, %v1268_v43  ;;  %v2670_v62 = vpack.c.bf16 %v1294_v47, %v1266_v2  ;;  %v2977_v12 = vpop.permute.xlu0 %2976  ;;  %v4115_v43 = vpop.permute.xlu1 %3031 }
 0x250   :  { %vm5298_vm12 = vcmp.ge.s32.totalorder %v3250_v18, 1  ;;  %vm5302_vm0 = vcmp.ge.s32.totalorder %v3255_v20, 1  ;;  %v2673_v37 = vpack.c.bf16 %v1325_v56, %v1309_v26  ;;  %vm5306_vm1 = vcmp.ge.s32.totalorder %v3243_v13, 1  ;;  %v403_v26 = vpop.f32.mrb[6].mxu0 }
 0x251   :  { %vm4103_vm14 = vmpackc.low %vm5258_vm5, %vm5298_vm12  ;;  %v2979_v2 = vunpack.i.h.bf16 %v2977_v12  ;;  %v2978_v47 = vunpack.i.l.bf16 %v2977_v12  ;;  %v5313_v56 = vmov 0 }
 0x252   :  { %vm4111_vm8 = vmand %vm5302_vm0, %vm5301_vm10  ;;  %vm5311_vm0 = vcmp.ge.s32.totalorder %v3257_v21, 2 }
 0x253   :  { %vm4121_vm3 = vmand %vm5306_vm1, %vm5305_vm7  ;;  %vm5312_vm7 = vcmp.ge.s32.totalorder %v3255_v20, 2  ;;  %v2987_v46 = vpop.permute.xlu0 %2986 }
 0x254   :  { %vm5309_vm12 = vmpackc.low %vm3269_vm4, %vm4011_vm11  ;;  %vm5316_vm11 = vnez %v5286_v22  ;;  %v4182_v22 = vpop.permute.xlu1 %1224  ;;  %v2989_v1 = vunpack.i.h.bf16 %v2987_v46  ;;  %v2988_v50 = vunpack.i.l.bf16 %v2987_v46 }
 0x255   :  { %2657 = vmatprep.subr.msk.bf16.mxu0 %vm5309_vm12, %v2655_v5  ;;  %vm5310_vm10 = vmpackc.low %vm3317_vm9, %vm4021_vm2  ;;  %vm5317_vm9 = vcmp.lt.s32.totalorder %v3263_v25, 14  ;;  %vm5318_vm2 = vcmp.ge.s32.totalorder %v3261_v24, 1  ;;  %v3004_v5 = vunpack.i.h.bf16 %v3994_v3 }
 0x256   :  { %2672 = vmatpush1.bf16.msk.msra.mxu1 %vm5310_vm10, %v2670_v62  ;;  %vm4140_vm1 = vmand %vm5312_vm7, %vm5311_vm0  ;;  %vm5129_vm10 = vcmp.lt.s32.totalorder %v3253_v19, 14  ;;  %vm5321_vm0 = vcmp.ge.s32.totalorder %v3257_v21, 1 }
 0x257   :  { %v5314_v56 = vsel %vm4140_vm1, 4294967295, %v5313_v56  ;;  %vm5315_vm4 = vmpackc.low %vm3291_vm13, %vm4031_vm15  ;;  %2675 = vmatprep.subr.msk.bf16.mxu1 %vm5316_vm11, %v2673_v37  ;;  %vm5324_vm11 = vcmp.ge.s32.totalorder %v3245_v14, 2  ;;  %v2997_v45 = vpop.permute.xlu0 %2996  ;;  %v5382_v37 = vmov 0.0  }
 0x258   :  { %2660 = vmatpush1.bf16.msk.msra.mxu0 %vm5315_vm4, %v2658_v30  ;;  %vm4155_vm12 = vmand %vm5318_vm2, %vm5317_vm9  ;;  %vm5325_vm9 = vcmp.ge.s32.totalorder %v3243_v13, 2  ;;  %v3003_v30 = vunpack.i.l.bf16 %v3994_v3 }
 0x259   :  { %vm4164_vm5 = vmand %vm5312_vm7, %vm5321_vm0  ;;  %vm5328_vm7 = vcmp.ge.s32.totalorder %v3245_v14, 1  ;;  %vm5334_vm0 = vcmp.ge.s32.totalorder %v3250_v18, 1 }
 0x25a   :  { %vm4175_vm2 = vmand %vm5325_vm9, %vm5324_vm11  ;;  %vm5332_vm11 = vcmp.lt.s32.totalorder %v3238_v8, 16 }
 0x25b   :  { %vm5329_vm13 = vmmov %vm5325_vm9  ;;  %v1310_v62 = vsel %vm5332_vm11, %v2979_v2, %v2983_v32 }
 0x25c   :  { %vm4188_vm4 = vmand %vm5329_vm13, %vm5328_vm7  ;;  %vm5338_vm7 = vcmp.lt.s32.totalorder %v3238_v8, 15 }
 0x25d   :  { %vm5333_vm9 = vmmov %vm5332_vm11  ;;  %v1326_v3 = vsel %vm5338_vm7, %v2989_v1, %v2993_v35 }
 0x25e   :  { %v1311_v12 = vsel %vm5333_vm9, %v2978_v47, %v2979_v2  ;;  %vm4202_vm15 = vmand %vm5334_vm0, %vm5129_vm10  ;;  %vm5344_vm10 = vcmp.ge.s32.totalorder %v3263_v25, 2  ;;  %vm5345_vm0 = vcmp.ge.s32.totalorder %v3261_v24, 2 }
 0x25f   :  { %vm5337_vm13 = vmmov %vm5333_vm9 }
 0x260   :  { %v1312_v46 = vsel %vm5337_vm13, %v2984_v59, %v2978_v47  ;;  %vm5339_vm11 = vmmov %vm5338_vm7  ;;  %v2676_v47 = vpack.c.bf16 %v1326_v3, %v1310_v62  ;;  %v3034_v62 = vunpack.i.h.bf16 %v4115_v43  ;;  %v2998_v3 = vunpack.i.l.bf16 %v2997_v45 }
 0x261   :  { %v1327_v32 = vsel %vm5339_vm11, %v2988_v50, %v2989_v1  ;;  %vm5340_vm9 = vmmov %vm5338_vm7  ;;  %vm5342_vm11 = vcmp.lt.s32.totalorder %v3238_v8, 33  ;;  %v4235_v1 = vpop.permute.xlu1 %1228  ;;  %vm5354_vm7 = vcmp.lt.s32.totalorder %v3238_v8, 14 }
 0x262   :  { %v1328_v2 = vsel %vm5340_vm9, %v2994_v48, %v2988_v50  ;;  %v2661_v6 = vpack.c.bf16 %v1327_v32, %v1311_v12  ;;  %v1148_v48 = vsel %vm5342_vm11, %v3013_v31, %v5341_v4  ;;  %vm5343_vm9 = vcmp.lt.s32.totalorder %v3238_v8, 14  ;;  %vm4241_vm1 = vmand %vm5345_vm0, %vm5344_vm10  ;;  %v3007_v4 = vpop.permute.xlu0 %3006 }
 0x263   :  { %v2664_v59 = vpack.c.bf16 %v1328_v2, %v1312_v46  ;;  %v1342_v35 = vsel %vm5343_vm9, %v3940_v23, %v4015_v0  ;;  %v3033_v12 = vunpack.i.l.bf16 %v4115_v43  ;;  %v2999_v46 = vunpack.i.h.bf16 %v2997_v45  ;;  %vm5350_vm13 = vmmov %vm5345_vm0 }
 0x264   :  { %2663 = vmatprep.subr.msk.bf16.mxu0 %vm4085_vm6, %v2661_v6  ;;  %vm5348_vm11 = vnez %v5296_v10  ;;  %vm5349_vm9 = vcmp.ge.s32.totalorder %v3263_v25, 1  ;;  %vm5353_vm0 = vcmp.lt.s32.totalorder %v3238_v8, 34  ;;  %v1344_v57 = vsel %vm5354_vm7, %v3916_v51, %v4002_v40 }
 0x265   :  { %2678 = vmatpush1.bf16.msk.msra.mxu1 %vm5348_vm11, %v2676_v47  ;;  %vm4255_vm10 = vmand %vm5350_vm13, %vm5349_vm9  ;;  %v1111_v2 = vsel %vm5353_vm0, %v3003_v30, %v3004_v5  ;;  %vm5131_vm11 = vcmp.lt.s32.totalorder %v3238_v8, 31  ;;  %2666 = vmatpush1.bf16.msk.msra.mxu0 %vm4103_vm14, %v2664_v59  ;;  %vm5355_vm13 = vcmp.ge.s32.totalorder %v3253_v19, 2  ;;  %vm5356_vm9 = vcmp.ge.s32.totalorder %v3250_v18, 2  ;;  %v4299_v15 = vpop.permute.xlu1 %3041 }
 0x266   :  { %2521 = vmatprep.subr.msk.mxu1 %vm4111_vm8, %v1342_v35  ;;  %vm4275_vm0 = vmand %vm5356_vm9, %vm5355_vm13  ;;  %v2691_v10 = vpack.c.bf16 %v1148_v48, %v1111_v2  ;;  %v3024_v45 = vunpack.i.h.bf16 %v4046_v9  ;;  %v3023_v47 = vunpack.i.l.bf16 %v4046_v9  ;;  %2510 = vmatprep.subr.msk.mxu0 %vm4121_vm3, %v1344_v57  ;;  %vm5359_vm8 = vcmp.ge.s32.totalorder %v3253_v19, 1  ;;  %v2501_v35 = vld [vmem:[%s5083_s3 + $0x8] sm:$0xff] }
 0x267   :  { %vm5360_vm7 = vmmov %vm5356_vm9  ;;  %vm5363_vm13 = vcmp.lt.s32.totalorder %v3238_v8, 14  ;;  %v3009_v59 = vunpack.i.h.bf16 %v3007_v4  ;;  %v3008_v48 = vunpack.i.l.bf16 %v3007_v4  ;;  %vm5365_vm3 = vcmp.lt.s32.totalorder %v3257_v21, 15 }
 0x268   :  { %vm4287_vm6 = vmand %vm5360_vm7, %vm5359_vm8  ;;  %v1343_v7 = vsel %vm5363_vm13, %v4002_v40, %v3940_v23  ;;  %vm5366_vm8 = vcmp.ge.s32.totalorder %v3255_v20, 2  ;;  %v5374_v4 = vunpack.i.h.bf16 %v3998_v41  ;;  %v3044_v50 = vunpack.i.h.bf16 %v4299_v15 }
 0x269   :  { %vm5364_vm9 = vmmov %vm5363_vm13  ;;  %vm5369_vm13 = vcmp.lt.s32.totalorder %v3238_v8, 34  ;;  %2522 = vmatpush1.msk.msra.mxu1 %vm4155_vm12, %v1343_v7  ;;  %vm5376_vm12 = vnez %v5314_v56  ;;  %v4356_v38 = vpop.permute.xlu1 %3051 }
 0x26a   :  { %v1345_v9 = vsel %vm5364_vm9, %v4015_v0, %v3916_v51  ;;  %vm4308_vm7 = vmand %vm5366_vm8, %vm5365_vm3  ;;  %v1202_v51 = vsel %vm5131_vm11, %v3033_v12, %v3034_v62  ;;  %v1112_v23 = vsel %vm5369_vm13, %v2999_v46, %v3003_v30  ;;  %vm5372_vm8 = vcmp.lt.s32.totalorder %v3238_v8, 33 }
 0x26b   :  { %vm5370_vm9 = vmmov %vm5369_vm13  ;;  %v1149_v57 = vsel %vm5372_vm8, %v3009_v59, %v3013_v31  ;;  %2511 = vmatpush1.msk.msra.mxu0 %vm4202_vm15, %v1345_v9  ;;  %vm5380_vm15 = vcmp.ge.s32.totalorder %v3255_v20, 2 }
 0x26c   :  { %v1113_v40 = vsel %vm5370_vm9, %v2998_v3, %v2999_v46  ;;  %vm5371_vm14 = vmmov %vm5370_vm9 }
 0x26d   :  { %v1114_v0 = vsel %vm5371_vm14, %v3004_v5, %v2998_v3  ;;  %vm2695_vm3 = vmpackc.low %vm4255_vm10, %vm4241_vm1  ;;  %v2694_v5 = vpack.c.bf16 %v1149_v57, %v1112_v23  ;;  %v3017_v3 = vpop.permute.xlu0 %3016  ;;  %vm5388_vm1 = vcmp.lt.s32.totalorder %v3253_v19, 15  ;;  %vm5389_vm10 = vcmp.ge.s32.totalorder %v3250_v18, 2  ;;  %v4394_v32 = vpop.permute.xlu1 %3061 }
 0x26e   :  { %vm5373_vm11 = vmmov %vm5372_vm8  ;;  %v3018_v7 = vunpack.i.l.bf16 %v3017_v3 }
 0x26f   :  { %v1150_v30 = vsel %vm5373_vm11, %v3008_v48, %v3009_v59  ;;  %vm5375_vm13 = vmmov %vm5372_vm8  ;;  %vm5378_vm11 = vcmp.lt.s32.totalorder %v3238_v8, 32  ;;  %vm5379_vm8 = vcmask 326656   ;;  %v3054_v59 = vunpack.i.h.bf16 %v4356_v38 }
 0x270   :  { %v1151_v46 = vsel %vm5375_vm13, %v5374_v4, %v3008_v48  ;;  %vm5377_vm14 = vmpackc.low %vm4164_vm5, %vm5376_vm12  ;;  %v1177_v41 = vsel %vm5378_vm11, %v3023_v47, %v3024_v45  ;;  %v2679_v28 = vpack.c.bf16 %v1150_v30, %v1113_v40  ;;  %2523 = vmatmul.mubr.msk.f32.vlgmr.msra.gmra.mrb[10].mxu1 %vm5379_vm8, %v2501_v35  ;;  %v3053_v48 = vunpack.i.l.bf16 %v4356_v38 }
 0x271   :  { %2693 = vmatprep.subr.msk.bf16.mxu1 %vm5377_vm14, %v2691_v10  ;;  %vm2683_vm9 = vmpackc.low %vm4287_vm6, %vm4275_vm0  ;;  %v2682_v31 = vpack.c.bf16 %v1151_v46, %v1114_v0  ;;  %v2697_v56 = vpack.c.bf16 %v1202_v51, %v1177_v41  ;;  %1648 = vmatprep.mubr.f32.mxu1 %v5382_v37  ;;  %v3019_v10 = vunpack.i.h.bf16 %v3017_v3  ;;  %vm5385_vm14 = vcmp.ge.s32.totalorder %v3243_v13, 2  ;;  %v3027_v60 = vpop.permute.xlu0 %3026  ;;  %v4440_v43 = vpop.permute.xlu1 %1714 }
 0x272   :  { %vm2698_vm5 = vmpackc.low %vm4308_vm7, %vm5380_vm15  ;;  %2696 = vmatpush1.bf16.msk.msra.mxu1 %vm2695_vm3, %v2694_v5  ;;  %vm5384_vm7 = vcmp.lt.s32.totalorder %v3245_v14, 15  ;;  %vm1230_vm6 = vcmp.lt.s32.totalorder %v3238_v8, 30  ;;  %v3029_v6 = vunpack.i.h.bf16 %v3027_v60  ;;  %v3028_v63 = vunpack.i.l.bf16 %v3027_v60 }
 0x273   :  { %vm5381_vm13 = vmmov %vm5379_vm8  ;;  %2699 = vmatprep.subr.msk.bf16.mxu1 %vm2698_vm5, %v2697_v56  ;;  %vm5395_vm15 = vcmp.lt.s32.totalorder %v3238_v8, 32  ;;  %v1233_v3 = vsel %vm1230_vm6, %v3965_v11, %v4182_v22  ;;  %v1232_v38 = vsel %vm1230_vm6, %v4182_v22, %v3980_v33  ;;  %v3064_v22 = vunpack.i.h.bf16 %v4394_v32 }
 0x274   :  { %2512 = vmatmul.mubr.msk.f32.vlgmr.msra.gmra.mrb[10].mxu0 %vm5381_vm13, %v2501_v35  ;;  %vm5383_vm12 = vmpackc.low %vm4188_vm4, %vm4175_vm2  ;;  %vm5386_vm4 = vcmp.lt.s32.totalorder %v3263_v25, 15  ;;  %vm5387_vm2 = vcmp.ge.s32.totalorder %v3261_v24, 2  ;;  %v1178_v35 = vsel %vm5395_vm15, %v3019_v10, %v3023_v47 }
 0x275   :  { %2681 = vmatprep.subr.msk.bf16.mxu0 %vm5383_vm12, %v2679_v28  ;;  %vm1207_vm11 = vmand %vm5385_vm14, %vm5384_vm7  ;;  %1577 = vmatprep.mubr.f32.mxu0 %v5382_v37  ;;  %v3037_v46 = vpop.permute.xlu0 %3036 }
 0x276   :  { %2684 = vmatpush1.bf16.msk.msra.mxu0 %vm2683_vm9, %v2682_v31  ;;  %vm1208_vm8 = vmand %vm5387_vm2, %vm5386_vm4  ;;  %v3039_v28 = vunpack.i.h.bf16 %v3037_v46  ;;  %v3038_v31 = vunpack.i.l.bf16 %v3037_v46 }
 0x277   :  { %vm4387_vm3 = vmand %vm5389_vm10, %vm5388_vm1  ;;  %vm5407_vm1 = vcmp.lt.s32.totalorder %v3257_v21, 14 }
 0x278   :  { %vm5392_vm0 = vmmov %vm5385_vm14  ;;  %vm5401_vm14 = vcmp.lt.s32.totalorder %v3238_v8, 31 }
 0x279   :  { %vm4398_vm9 = vmpackc.low %vm1207_vm11, %vm5392_vm0  ;;  %v1203_v40 = vsel %vm5401_vm14, %v3029_v6, %v3033_v12  ;;  %v3047_v60 = vpop.permute.xlu0 %3046 }
 0x27a   :  { %vm5396_vm5 = vmmov %vm5395_vm15  ;;  %v2700_v4 = vpack.c.bf16 %v1203_v40, %v1178_v35  ;;  %vm1663_vm15 = vcmp.lt.s32.totalorder %v3238_v8, 2  ;;  %v3063_v35 = vunpack.i.l.bf16 %v4394_v32 }
 0x27b   :  { %v1179_v2 = vsel %vm5396_vm5, %v3018_v7, %v3019_v10  ;;  %vm5397_vm13 = vmmov %vm5387_vm2  ;;  %v1234_v10 = vsel %vm1230_vm6, %v4235_v1, %v3965_v11  ;;  %v3049_v11 = vunpack.i.h.bf16 %v3047_v60  ;;  %v1666_v51 = vsel %vm1663_vm15, %v3038_v31, %v3039_v28 }
 0x27c   :  { %vm4410_vm12 = vmpackc.low %vm1208_vm8, %vm5397_vm13 }
 0x27d   :  { %vm5400_vm7 = vmmov %vm5396_vm5  ;;  %vm5410_vm5 = vcmp.ge.s32.totalorder %v3243_v13, 2  ;;  %2702 = vmatpush1.bf16.msk.msra.mxu1 %vm4410_vm12, %v2700_v4 }
 0x27e   :  { %v1180_v23 = vsel %vm5400_vm7, %v3024_v45, %v3018_v7  ;;  %vm5402_vm11 = vmmov %vm5401_vm14  ;;  %v3043_v45 = vunpack.i.l.bf16 %v4299_v15  ;;  %v1231_v15 = vsel %vm1230_vm6, %v3980_v33, %v4235_v1  ;;  %vm5413_vm7 = vcmp.lt.s32.totalorder %v3238_v8, 1 }
 0x27f   :  { %v1204_v47 = vsel %vm5402_vm11, %v3028_v63, %v3029_v6  ;;  %vm5403_vm4 = vmmov %vm5402_vm11  ;;  %v1688_v41 = vsel %vm5413_vm7, %v3053_v48, %v3054_v59  ;;  %vm5414_vm14 = vcmp.lt.s32.totalorder %v3263_v25, 14  ;;  %vm5415_vm11 = vcmp.ge.s32.totalorder %v3261_v24, 2  ;;  %v4503_v6 = vpop.permute.xlu1 %1718 }
 0x280   :  { %v1205_v0 = vsel %vm5403_vm4, %v3034_v62, %v3028_v63  ;;  %vm5404_vm2 = vmmov %vm5389_vm10  ;;  %v2685_v30 = vpack.c.bf16 %v1204_v47, %v1179_v2  ;;  %vm5408_vm10 = vcmp.ge.s32.totalorder %v3255_v20, 2  ;;  %v1664_v7 = vsel %vm1663_vm15, %v3043_v45, %v3044_v50  ;;  %v1255_v63 = vld [vmem:[%s5083_s3] sm:$0xff] }
 0x281   :  { %vm4430_vm8 = vmpackc.low %vm4387_vm3, %vm5404_vm2  ;;  %v2688_v12 = vpack.c.bf16 %v1205_v0, %v1180_v23  ;;  %vm5409_vm3 = vcmp.lt.s32.totalorder %v3245_v14, 14  ;;  %v2715_v33 = vpack.c.bf16 %v1688_v41, %v1664_v7  ;;  %v3048_v1 = vunpack.i.l.bf16 %v3047_v60 }
 0x282   :  { %vm1242_vm0 = vmand %vm5408_vm10, %vm5407_vm1  ;;  %2687 = vmatprep.subr.msk.bf16.mxu0 %vm4398_vm9, %v2685_v30  ;;  %vm5418_vm9 = vcmp.lt.s32.totalorder %v3253_v19, 14  ;;  %vm5423_vm1 = vcmp.ge.s32.totalorder %v3257_v21, 1  ;;  %vm5426_vm6 = vcmp.ge.s32.totalorder %v3245_v14, 2  ;;  %v1665_v2 = vsel %vm1663_vm15, %v3039_v28, %v3043_v45  ;;  %v3057_v30 = vpop.permute.xlu0 %3056 }
 0x283   :  { %vm4446_vm13 = vmand %vm5410_vm5, %vm5409_vm3  ;;  %2690 = vmatpush1.bf16.msk.msra.mxu0 %vm4430_vm8, %v2688_v12  ;;  %2543 = vmatprep.subr.msk.mxu1 %vm1242_vm0, %v1231_v15  ;;  %vm5422_vm8 = vcmp.ge.s32.totalorder %v3257_v21, 2  ;;  %vm5427_vm0 = vcmp.ge.s32.totalorder %v3245_v14, 1  ;;  %v1667_v23 = vsel %vm1663_vm15, %v3044_v50, %v3038_v31  ;;  %vm5430_vm5 = vcmp.ge.s32.totalorder %v3263_v25, 2  ;;  %v4560_v12 = vpop.permute.xlu1 %3071 }
 0x284   :  { %vm4464_vm4 = vmand %vm5415_vm11, %vm5414_vm14  ;;  %2532 = vmatprep.subr.msk.mxu0 %vm4446_vm13, %v1233_v3  ;;  %vm5431_vm13 = vcmp.ge.s32.totalorder %v3263_v25, 1  ;;  %vm5434_vm14 = vcmp.lt.s32.totalorder %v3238_v8, 1  ;;  %vm5437_vm15 = vcmp.ge.s32.totalorder %v3253_v19, 2  ;;  %v3059_v4 = vunpack.i.h.bf16 %v3057_v30 }
 0x285   :  { %vm5419_vm12 = vmmov %vm5404_vm2  ;;  %2544 = vmatpush1.msk.msra.mxu1 %vm4464_vm4, %v1232_v38  ;;  %v1689_v32 = vsel %vm5434_vm14, %v3049_v11, %v3053_v48  ;;  %vm5438_vm4 = vcmp.ge.s32.totalorder %v3253_v19, 1  ;;  %v3058_v46 = vunpack.i.l.bf16 %v3057_v30 }
 0x286   :  { %vm4478_vm2 = vmand %vm5419_vm12, %vm5418_vm9  ;;  %v2718_v45 = vpack.c.bf16 %v1689_v32, %v1665_v2  ;;  %v3067_v7 = vpop.permute.xlu0 %3066  ;;  %v3074_v32 = vunpack.i.h.bf16 %v4560_v12 }
 0x287   :  { %vm4498_vm10 = vmpackc.low %vm5423_vm1, %vm5422_vm8  ;;  %2533 = vmatpush1.msk.msra.mxu0 %vm4478_vm2, %v1234_v10  ;;  %vm5441_vm8 = vcmask 326656   ;;  %vm5443_vm2 = vmmov 1  }
 0x288   :  { %vm4512_vm3 = vmpackc.low %vm5427_vm0, %vm5426_vm6  ;;  %2717 = vmatprep.subr.msk.bf16.mxu1 %vm4498_vm10, %v2715_v33  ;;  %2545 = vmatmul.mubr.msk.f32.vlgmr.msra.gmra.mrb[10].mxu1 %vm5441_vm8, %v1255_v63  ;;  %vm5444_vm6 = vcmp.lt.s32.totalorder %v3245_v14, 15  ;;  %vm5447_vm0 = vcmp.lt.s32.totalorder %v3257_v21, 15 }
 0x289   :  { %vm4529_vm7 = vmpackc.low %vm5431_vm13, %vm5430_vm5  ;;  %1877 = vmatprep.mubr.f32.mxu1 %v5382_v37  ;;  %vm5450_vm13 = vcmp.lt.s32.totalorder %v3238_v8, 127 }
 0x28a   :  { %vm5435_vm11 = vmmov %vm5434_vm14  ;;  %v1704_v15 = vsel %vm5450_vm13, %v3063_v35, %v3064_v22  ;;  %2720 = vmatpush1.bf16.msk.msra.mxu1 %vm4529_vm7, %v2718_v45  ;;  %vm5451_vm14 = vcmp.lt.s32.totalorder %v3253_v19, 15  ;;  %vm5458_vm7 = vcmp.lt.s32.totalorder %v3243_v13, 15 }
 0x28b   :  { %v1690_v47 = vsel %vm5435_vm11, %v3048_v1, %v3049_v11  ;;  %vm5436_vm9 = vmmov %vm5435_vm11  ;;  %v2724_v33 = vpack.c.bf16 %v1704_v15, %v3635_v53  ;;  %v3069_v11 = vunpack.i.h.bf16 %v3067_v7  ;;  %v405_v53 = vpop.f32.mrb[7].mxu0 }
 0x28c   :  { %v1691_v50 = vsel %vm5436_vm9, %v3054_v59, %v3048_v1  ;;  %vm4547_vm12 = vmpackc.low %vm5438_vm4, %vm5437_vm15  ;;  %v2703_v48 = vpack.c.bf16 %v1690_v47, %v1666_v51  ;;  %v509_v1 = vmax.f32 %v403_v26, 0.0  ;;  %v510_v40 = vmax.f32 %v405_v53, 0.0 }
 0x28d   :  { %v2706_v57 = vpack.c.bf16 %v1691_v50, %v1667_v23  ;;  %vm5442_vm1 = vmmov %vm5441_vm8  ;;  %v3073_v47 = vunpack.i.l.bf16 %v4560_v12  ;;  %v3077_v50 = vpop.permute.xlu0 %3076 }
 0x28e   :  { %2534 = vmatmul.mubr.msk.f32.vlgmr.msra.gmra.mrb[10].mxu0 %vm5442_vm1, %v1255_v63  ;;  %vm4556_vm10 = vmpackc.low %vm5444_vm6, %vm5443_vm2  ;;  %2705 = vmatprep.subr.msk.bf16.mxu0 %vm4512_vm3, %v2703_v48  ;;  %vm5457_vm3 = vcmp.ge.s32.totalorder %v3245_v14, 2  ;;  %vm1720_vm1 = vcmp.lt.s32.totalorder %v3238_v8, 126  ;;  %v492_v63 = vpop.f32.mrb[6].mxu1  ;;  %517 = vst [vmem:[%s5081_s4 + $0x60] sm:$0xff] %v509_v1  ;;  %v3079_v59 = vunpack.i.h.bf16 %v3077_v50  ;;  %v3078_v12 = vunpack.i.l.bf16 %v3077_v50 }
 0x28f   :  { %vm4565_vm5 = vmpackc.low %vm5447_vm0, %vm5443_vm2  ;;  %1806 = vmatprep.mubr.f32.mxu0 %v5382_v37  ;;  %2708 = vmatpush1.bf16.msk.msra.mxu0 %vm4547_vm12, %v2706_v57  ;;  %vm5461_vm12 = vcmp.lt.s32.totalorder %v3263_v25, 15  ;;  %v1722_v2 = vsel %vm1720_vm1, %v4440_v43, %v3992_v17  ;;  %v1724_v51 = vsel %vm1720_vm1, %v4503_v6, %v3988_v61  ;;  %v1723_v57 = vsel %vm1720_vm1, %v3988_v61, %v4440_v43 }
 0x290   :  { %vm4580_vm11 = vmpackc.low %vm5451_vm14, %vm5443_vm2  ;;  %vm1896_vm14 = vcmp.lt.s32.totalorder %v3238_v8, 114  ;;  %v1721_v45 = vsel %vm1720_vm1, %v3992_v17, %v4503_v6  ;;  %518 = vst [vmem:[%s5081_s4 + $0x68] sm:$0xff] %v510_v40  ;;  %vm5479_vm1 = vcmp.lt.s32.totalorder %v3238_v8, 113 }
 0x291   :  { %vm5454_vm9 = vmmov %vm5450_vm13  ;;  %v1898_v17 = vsel %vm1896_vm14, %v3069_v11, %v3073_v47 }
 0x292   :  { %v1705_v28 = vsel %vm5454_vm9, %v3059_v4, %v3063_v35  ;;  %vm5455_vm15 = vmmov %vm5454_vm9  ;;  %v494_v35 = vpop.f32.mrb[7].mxu1 }
 0x293   :  { %v1706_v31 = vsel %vm5455_vm15, %v3058_v46, %v3059_v4  ;;  %vm5456_vm4 = vmmov %vm5454_vm9  ;;  %v2709_v56 = vpack.c.bf16 %v1705_v28, %v3666_v58  ;;  %vm5470_vm9 = vcmp.lt.s32.totalorder %v3257_v21, 14  ;;  %vm5471_vm15 = vcmp.ge.s32.totalorder %v3253_v19, 2  ;;  %v2546_v4 = vld [vmem:[%s5083_s3 + $0x10] sm:$0xff] }
 0x294   :  { %v1707_v5 = vsel %vm5456_vm4, %v3064_v22, %v3058_v46  ;;  %vm4596_vm8 = vmand %vm5458_vm7, %vm5457_vm3  ;;  %v2712_v38 = vpack.c.bf16 %v1706_v31, %v3631_v52  ;;  %v3082_v22 = vpop.permute.xlu1 %3081  ;;  %v3068_v52 = vunpack.i.l.bf16 %v3067_v7  ;;  %vm5472_vm4 = vcmp.lt.s32.totalorder %v3250_v18, 15 }
 0x295   :  { %v2721_v10 = vpack.c.bf16 %v1707_v5, %v3637_v54  ;;  %vm4607_vm6 = vmpackc.low %vm5461_vm12, %vm5443_vm2  ;;  %v3084_v58 = vunpack.i.h.bf16 %v3082_v22  ;;  %v3083_v9 = vunpack.i.l.bf16 %v3082_v22  ;;  %2711 = vmatprep.subr.msk.bf16.mxu0 %vm4556_vm10, %v2709_v56  ;;  %vm5464_vm2 = vnez %v5167_v42 }
 0x296   :  { %vm2728_vm0 = vmpackc.low %vm5464_vm2, %vm4596_vm8  ;;  %v511_v54 = vmax.f32 %v492_v63, 0.0  ;;  %2714 = vmatpush1.bf16.msk.msra.mxu0 %vm4580_vm11, %v2712_v38  ;;  %vm5465_vm10 = vcmp.ge.s32.totalorder %v3257_v21, 2  ;;  %vm5469_vm11 = vcmp.lt.s32.totalorder %v3245_v14, 14  ;;  %v512_v48 = vmax.f32 %v494_v35, 0.0  ;;  %v3087_v38 = vpop.permute.xlu0 %3086 }
 0x297   :  { %2723 = vmatprep.subr.msk.bf16.mxu1 %vm4565_vm5, %v2721_v10  ;;  %vm5466_vm5 = vcmp.lt.s32.totalorder %v3255_v20, 15  ;;  %2553 = vmatprep.subr.msk.mxu0 %vm5469_vm11, %v1722_v2  ;;  %vm4654_vm3 = vmand %vm5472_vm4, %vm5471_vm15  ;;  %vm5475_vm7 = vcmp.ge.s32.totalorder %v3263_v25, 2  ;;  %vm5476_vm12 = vcmp.lt.s32.totalorder %v3261_v24, 15  ;;  %v1925_v61 = vsel %vm5479_vm1, %v3083_v9, %v3084_v58 }
 0x298   :  { %2726 = vmatpush1.bf16.msk.msra.mxu1 %vm4607_vm6, %v2724_v33  ;;  %vm4636_vm13 = vmand %vm5466_vm5, %vm5465_vm10  ;;  %519 = vst [vmem:[%s5081_s4 + $0x70] sm:$0xff] %v511_v54  ;;  %v4669_v30 = vpop.permute.xlu1 %3091  ;;  %v1899_v43 = vsel %vm1896_vm14, %v3068_v52, %v3069_v11  ;;  %v1900_v6 = vsel %vm1896_vm14, %v3074_v32, %v3068_v52  ;;  %vm5480_vm10 = vnez %v5172_v49  ;;  %vm5484_vm4 = vcmp.lt.s32.totalorder %v3253_v19, 14 }
 0x299   :  { %2562 = vmatprep.subr.msk.mxu1 %vm5470_vm9, %v1724_v51  ;;  %vm4678_vm6 = vmand %vm5476_vm12, %vm5475_vm7  ;;  %520 = vst [vmem:[%s5081_s4 + $0x78] sm:$0xff] %v512_v48  ;;  %vm5485_vm7 = vcmp.lt.s32.totalorder %v3263_v25, 14  ;;  %vm5486_vm12 = vnez %v5163_v34  ;;  %v1897_v28 = vsel %vm1896_vm14, %v3073_v47, %v3074_v32  ;;  %v3089_v22 = vunpack.i.h.bf16 %v3087_v38 }
 0x29a   :  { %vm2740_vm5 = vmpackc.low %vm5480_vm10, %vm4636_vm13  ;;  %2554 = vmatpush1.msk.msra.mxu0 %vm5484_vm4, %v1723_v57  ;;  %v2742_v10 = vpack.c.bf16 %v1925_v61, %v1897_v28  ;;  %v3088_v11 = vunpack.i.l.bf16 %v3087_v38  ;;  %vm5499_vm2 = vcmp.lt.s32.totalorder %v3250_v18, 15  ;;  %v3094_v49 = vunpack.i.h.bf16 %v4669_v30 }
 0x29b   :  { %vm5481_vm11 = vmmov %vm5479_vm1  ;;  %vm5503_vm10 = vcmp.lt.s32.totalorder %v3261_v24, 15 }
 0x29c   :  { %v1926_v62 = vsel %vm5481_vm11, %v3079_v59, %v3083_v9  ;;  %vm5482_vm9 = vmmov %vm5479_vm1  ;;  %2563 = vmatpush1.msk.msra.mxu1 %vm5485_vm7, %v1721_v45  ;;  %vm5487_vm11 = vcmask 326656   ;;  %v3102_v7 = vpop.permute.xlu1 %3101  ;;  %vm5490_vm7 = vcmp.lt.s32.totalorder %v3243_v13, 15 }
 0x29d   :  { %v1927_v15 = vsel %vm5482_vm9, %v3078_v12, %v3079_v59  ;;  %vm5483_vm15 = vmmov %vm5479_vm1  ;;  %v2727_v31 = vpack.c.bf16 %v1926_v62, %v1898_v17  ;;  %2555 = vmatmul.mubr.msk.f32.vlgmr.msra.gmra.mrb[10].mxu0 %vm5487_vm11, %v2546_v4  ;;  %vm5488_vm9 = vnez %v5159_v29  ;;  %vm5491_vm1 = vnez %v5181_v16 }
 0x29e   :  { %v1928_v41 = vsel %vm5483_vm15, %v3084_v58, %v3078_v12  ;;  %v2730_v5 = vpack.c.bf16 %v1927_v15, %v1899_v43  ;;  %vm2743_vm15 = vmpackc.low %vm5488_vm9, %vm4678_vm6  ;;  %2063 = vmatprep.mubr.f32.mxu0 %v5382_v37  ;;  %v3104_v26 = vunpack.i.h.bf16 %v3102_v7  ;;  %v3103_v33 = vunpack.i.l.bf16 %v3102_v7  ;;  %v2565_v43 = vld [vmem:[%s5083_s3 + $0x18] sm:$0xff] }
 0x29f   :  { %v2739_v56 = vpack.c.bf16 %v1928_v41, %v1900_v6  ;;  %vm5489_vm4 = vmmov %vm5487_vm11  ;;  %2729 = vmatprep.subr.msk.bf16.mxu0 %vm2728_vm0, %v2727_v31  ;;  %vm5494_vm6 = vcmp.lt.s32.totalorder %v3255_v20, 15  ;;  %vm5500_vm0 = vnez %v5194_v36  ;;  %v3093_v16 = vunpack.i.l.bf16 %v4669_v30 }
 0x2a0   :  { %2564 = vmatmul.mubr.msk.f32.vlgmr.msra.gmra.mrb[10].mxu1 %vm5489_vm4, %v2546_v4  ;;  %vm4726_vm14 = vmpackc.low %vm5491_vm1, %vm5490_vm7  ;;  %vm5495_vm1 = vnez %v5187_v27  ;;  %v3097_v27 = vpop.permute.xlu0 %3096  ;;  %v1968_v36 = vpop.permute.xlu1 %1967  ;;  %vm5507_vm9 = vcmp.lt.s32.totalorder %v3245_v14, 14 }
 0x2a1   :  { %2741 = vmatprep.subr.msk.bf16.mxu1 %vm2740_vm5, %v2739_v56  ;;  %vm4745_vm11 = vmpackc.low %vm5495_vm1, %vm5494_vm6  ;;  %vm5504_vm5 = vnez %v5199_v44  ;;  %2134 = vmatprep.mubr.f32.mxu1 %v5382_v37  ;;  %v3099_v3 = vunpack.i.h.bf16 %v3097_v27  ;;  %v3098_v1 = vunpack.i.l.bf16 %v3097_v27  ;;  %vm5511_vm6 = vcmp.lt.s32.totalorder %v3238_v8, 111 }
 0x2a2   :  { %vm5498_vm8 = vmpackc.low %vm5486_vm12, %vm4654_vm3  ;;  %2744 = vmatpush1.bf16.msk.msra.mxu1 %vm2743_vm15, %v2742_v10  ;;  %vm1973_vm12 = vcmp.lt.s32.totalorder %v3238_v8, 110  ;;  %v1957_v44 = vsel %vm5511_vm6, %v3103_v33, %v3104_v26  ;;  %vm5512_vm1 = vcmp.lt.s32.totalorder %v3238_v8, 112 }
 0x2a3   :  { %2732 = vmatpush1.bf16.msk.msra.mxu0 %vm5498_vm8, %v2730_v5  ;;  %vm4758_vm13 = vmpackc.low %vm5500_vm0, %vm5499_vm2  ;;  %v1942_v58 = vsel %vm5512_vm1, %v3089_v22, %v3093_v16  ;;  %vm5514_vm2 = vcmp.lt.s32.totalorder %v3257_v21, 14  ;;  %vm5515_vm0 = vcmp.lt.s32.totalorder %v3255_v20, 15  ;;  %v1959_v35 = vsel %vm5511_vm6, %v3098_v1, %v3099_v3 }
 0x2a4   :  { %vm4768_vm3 = vmpackc.low %vm5504_vm5, %vm5503_vm10  ;;  %v3107_v50 = vpop.permute.xlu0 %3106  ;;  %v1972_v57 = vpop.permute.xlu1 %1971  ;;  %v1975_v59 = vsel %vm1973_vm12, %v1968_v36, %v4000_v39  ;;  %v1976_v6 = vsel %vm1973_vm12, %v3996_v55, %v1968_v36 }
 0x2a5   :  { %vm5508_vm15 = vmmov %vm5490_vm7  ;;  %vm2159_vm7 = vcmp.lt.s32.totalorder %v3243_v13, 14  ;;  %v1977_v12 = vsel %vm1973_vm12, %v1972_v57, %v3996_v55  ;;  %v1974_v62 = vsel %vm1973_vm12, %v4000_v39, %v1972_v57  ;;  %v3109_v39 = vunpack.i.h.bf16 %v3107_v50 }
 0x2a6   :  { %vm4778_vm4 = vmand %vm5508_vm15, %vm5507_vm9  ;;  %v3108_v5 = vunpack.i.l.bf16 %v3107_v50 }
 0x2a7   :  { %vm5513_vm8 = vmmov %vm5512_vm1 }
 0x2a8   :  { %v1943_v9 = vsel %vm5513_vm8, %v3088_v11, %v3089_v22  ;;  %vm4793_vm10 = vmand %vm5515_vm0, %vm5514_vm2  ;;  %vm5521_vm8 = vcmp.lt.s32.totalorder %v3253_v19, 14  ;;  %vm5522_vm2 = vcmp.lt.s32.totalorder %v3250_v18, 15  ;;  %v3117_v46 = vpop.permute.xlu0 %3116  ;;  %v3112_v17 = vpop.permute.xlu1 %3111 }
 0x2a9   :  { %vm5518_vm9 = vmmov %vm5512_vm1  ;;  %v2736_v32 = vpack.c.bf16 %v1959_v35, %v1943_v9  ;;  %v3114_v15 = vunpack.i.h.bf16 %v3112_v17  ;;  %v3113_v41 = vunpack.i.l.bf16 %v3112_v17  ;;  %v3119_v28 = vunpack.i.h.bf16 %v3117_v46 }
 0x2aa   :  { %v1944_v54 = vsel %vm5518_vm9, %v3094_v49, %v3088_v11  ;;  %vm5519_vm15 = vmmov %vm5511_vm6  ;;  %v3118_v31 = vunpack.i.l.bf16 %v3117_v46 }
 0x2ab   :  { %v1958_v53 = vsel %vm5519_vm15, %v3099_v3, %v3103_v33  ;;  %vm5520_vm1 = vmmov %vm5511_vm6  ;;  %vm5527_vm15 = vcmp.lt.s32.totalorder %v3261_v24, 15 }
 0x2ac   :  { %v1960_v2 = vsel %vm5520_vm1, %v3104_v26, %v3098_v1  ;;  %vm4810_vm0 = vmand %vm5522_vm2, %vm5521_vm8  ;;  %v2733_v40 = vpack.c.bf16 %v1958_v53, %v1942_v58  ;;  %vm5530_vm1 = vcmp.ge.s32.totalorder %v3245_v14, 2  ;;  %v3122_v56 = vpop.permute.xlu1 %3121  ;;  %v3127_v38 = vpop.permute.xlu0 %3126 }
 0x2ad   :  { %vm5525_vm5 = vmmov %vm5518_vm9  ;;  %v2745_v47 = vpack.c.bf16 %v1960_v2, %v1944_v54  ;;  %vm5526_vm9 = vcmp.lt.s32.totalorder %v3263_v25, 14  ;;  %v3124_v7 = vunpack.i.h.bf16 %v3122_v56  ;;  %v3123_v60 = vunpack.i.l.bf16 %v3122_v56 }
 0x2ae   :  { %v1941_v23 = vsel %vm5525_vm5, %v3093_v16, %v3094_v49  ;;  %vm4820_vm6 = vmand %vm5527_vm15, %vm5526_vm9  ;;  %2735 = vmatprep.subr.msk.bf16.mxu0 %vm4726_vm14, %v2733_v40  ;;  %vm5533_vm5 = vcmp.ge.s32.totalorder %v3245_v14, 1  ;;  %vm5536_vm14 = vcmp.ge.s32.totalorder %v3257_v21, 2  ;;  %v3129_v51 = vunpack.i.h.bf16 %v3127_v38 }
 0x2af   :  { %v2748_v48 = vpack.c.bf16 %v1957_v44, %v1941_v23  ;;  %vm4828_vm8 = vmand %vm2159_vm7, %vm5530_vm1  ;;  %2747 = vmatprep.subr.msk.bf16.mxu1 %vm4745_vm11, %v2745_v47  ;;  %2738 = vmatpush1.bf16.msk.msra.mxu0 %vm4758_vm13, %v2736_v32  ;;  %vm5537_vm11 = vcmp.lt.s32.totalorder %v3255_v20, 14  ;;  %vm5540_vm13 = vcmp.ge.s32.totalorder %v3257_v21, 1  ;;  %vm5132_vm1 = vcmp.lt.s32.totalorder %v3250_v18, 14 }
 0x2b0   :  { %vm4840_vm2 = vmand %vm2159_vm7, %vm5533_vm5  ;;  %2574 = vmatprep.subr.msk.mxu0 %vm4778_vm4, %v1975_v59  ;;  %vm2186_vm5 = vcmp.lt.s32.totalorder %v3238_v8, 97  ;;  %v3132_v63 = vpop.permute.xlu1 %3131  ;;  %v3137_v44 = vpop.permute.xlu0 %3136  ;;  %v3128_v23 = vunpack.i.l.bf16 %v3127_v38 }
 0x2b1   :  { %2750 = vmatpush1.bf16.msk.msra.mxu1 %vm4768_vm3, %v2748_v48  ;;  %vm4858_vm9 = vmand %vm5537_vm11, %vm5536_vm14  ;;  %vm5544_vm14 = vcmask 326656   ;;  %v2189_v11 = vsel %vm2186_vm5, %v3118_v31, %v3119_v28  ;;  %v2187_v49 = vsel %vm2186_vm5, %v3123_v60, %v3124_v7  ;;  %v2190_v16 = vsel %vm2186_vm5, %v3124_v7, %v3118_v31 }
 0x2b2   :  { %2585 = vmatprep.subr.msk.mxu1 %vm4793_vm10, %v1977_v12  ;;  %vm5541_vm15 = vmmov %vm5537_vm11  ;;  %vm2160_vm10 = vcmp.lt.s32.totalorder %v3261_v24, 14  ;;  %vm5545_vm11 = vcmp.ge.s32.totalorder %v3253_v19, 2  ;;  %v3134_v9 = vunpack.i.h.bf16 %v3132_v63  ;;  %v3133_v52 = vunpack.i.l.bf16 %v3132_v63 }
 0x2b3   :  { %vm4870_vm3 = vmand %vm5541_vm15, %vm5540_vm13  ;;  %2575 = vmatpush1.msk.msra.mxu0 %vm4810_vm0, %v1976_v6  ;;  %v3139_v54 = vunpack.i.h.bf16 %v3137_v44  ;;  %v3138_v53 = vunpack.i.l.bf16 %v3137_v44 }
 0x2b4   :  { %vm2752_vm4 = vmpackc.low %vm4840_vm2, %vm4828_vm8  ;;  %2576 = vmatmul.mubr.msk.f32.vlgmr.msra.gmra.mrb[10].mxu0 %vm5544_vm14, %v2565_v43  ;;  %vm5564_vm8 = vcmp.lt.s32.totalorder %v3257_v21, 15  ;;  %vm5565_vm2 = vcmp.lt.s32.totalorder %v3255_v20, 14  ;;  %v3142_v40 = vpop.permute.xlu1 %3141  ;;  %v2262_v32 = vpop.permute.xlu0 %2261 }
 0x2b5   :  { %2586 = vmatpush1.msk.msra.mxu1 %vm4820_vm6, %v1974_v62  ;;  %vm4903_vm13 = vmand %vm5132_vm1, %vm5545_vm11  ;;  %vm5549_vm6 = vcmp.ge.s32.totalorder %v3253_v19, 1  ;;  %2359 = vmatprep.mubr.f32.mxu0 %v5382_v37  ;;  %vm5552_vm11 = vcmp.ge.s32.totalorder %v3263_v25, 2  ;;  %v3144_v47 = vunpack.i.h.bf16 %v3142_v40  ;;  %v3143_v50 = vunpack.i.l.bf16 %v3142_v40 }
 0x2b6   :  { %vm5548_vm0 = vmmov %vm5544_vm14  ;;  %vm2153_vm14 = vcmp.lt.s32.totalorder %v3238_v8, 98 }
 0x2b7   :  { %2587 = vmatmul.mubr.msk.f32.vlgmr.msra.gmra.mrb[10].mxu1 %vm5548_vm0, %v2565_v43  ;;  %vm4912_vm15 = vmand %vm5132_vm1, %vm5549_vm6  ;;  %v2154_v33 = vsel %vm2153_vm14, %v3113_v41, %v3114_v15  ;;  %v2155_v22 = vsel %vm2153_vm14, %v3109_v39, %v3113_v41  ;;  %vm5555_vm0 = vcmp.ge.s32.totalorder %v3263_v25, 1  ;;  %v2157_v42 = vsel %vm2153_vm14, %v3114_v15, %v3108_v5 }
 0x2b8   :  { %vm4922_vm12 = vmand %vm2160_vm10, %vm5552_vm11  ;;  %2430 = vmatprep.mubr.f32.mxu1 %v5382_v37  ;;  %v2188_v37 = vsel %vm2186_vm5, %v3119_v28, %v3123_v60  ;;  %vm5558_vm11 = vcmp.lt.s32.totalorder %v3245_v14, 15  ;;  %v2156_v34 = vsel %vm2153_vm14, %v3108_v5, %v3109_v39  ;;  %v2763_v3 = vpack.c.bf16 %v2190_v16, %v2157_v42  ;;  %v2264_v62 = vpop.permute.xlu1 %2263  ;;  %v2266_v15 = vpop.permute.xlu0 %2265 }
 0x2b9   :  { %vm4933_vm6 = vmand %vm2160_vm10, %vm5555_vm0  ;;  %v2751_v36 = vpack.c.bf16 %v2188_v37, %v2155_v22  ;;  %v2766_v1 = vpack.c.bf16 %v2187_v49, %v2154_v33  ;;  %v2754_v58 = vpack.c.bf16 %v2189_v11, %v2156_v34  ;;  %vm2215_vm14 = vcmp.lt.s32.totalorder %v3238_v8, 96 }
 0x2ba   :  { %vm4947_vm1 = vmand %vm2159_vm7, %vm5558_vm11  ;;  %v2216_v48 = vsel %vm2215_vm14, %v3133_v52, %v3134_v9  ;;  %v2217_v57 = vsel %vm2215_vm14, %v3129_v51, %v3133_v52  ;;  %v2219_v59 = vsel %vm2215_vm14, %v3134_v9, %v3128_v23  ;;  %v2218_v61 = vsel %vm2215_vm14, %v3128_v23, %v3129_v51 }
 0x2bb   :  { %vm2755_vm0 = vmpackc.low %vm4912_vm15, %vm4903_vm13  ;;  %2753 = vmatprep.subr.msk.bf16.mxu0 %vm2752_vm4, %v2751_v36  ;;  %vm2240_vm15 = vcmp.lt.s32.totalorder %v3238_v8, 95 }
 0x2bc   :  { %vm2767_vm5 = vmpackc.low %vm4933_vm6, %vm4922_vm12  ;;  %2756 = vmatpush1.bf16.msk.msra.mxu0 %vm2755_vm0, %v2754_v58  ;;  %vm5570_vm6 = vcmp.lt.s32.totalorder %v3263_v25, 15  ;;  %v2243_v45 = vsel %vm2240_vm15, %v3138_v53, %v3139_v54  ;;  %vm2269_vm0 = vcmp.lt.s32.totalorder %v3238_v8, 94  ;;  %v2241_v12 = vsel %vm2240_vm15, %v3143_v50, %v3144_v47  ;;  %v2268_v13 = vpop.permute.xlu1 %2267 }
 0x2bd   :  { %vm5561_vm13 = vmpackc.low %vm4870_vm3, %vm4858_vm9  ;;  %vm5568_vm9 = vcmp.lt.s32.totalorder %v3253_v19, 15  ;;  %vm5569_vm3 = vcmp.lt.s32.totalorder %v3250_v18, 14  ;;  %v2242_v4 = vsel %vm2240_vm15, %v3139_v54, %v3143_v50  ;;  %v2244_v46 = vsel %vm2240_vm15, %v3144_v47, %v3138_v53 }
 0x2be   :  { %2765 = vmatprep.subr.msk.bf16.mxu1 %vm5561_vm13, %v2763_v3  ;;  %vm4973_vm12 = vmpackc.low %vm4947_vm1, %vm2159_vm7  ;;  %v2757_v17 = vpack.c.bf16 %v2242_v4, %v2217_v57  ;;  %v2769_v43 = vpack.c.bf16 %v2244_v46, %v2219_v59  ;;  %v2772_v6 = vpack.c.bf16 %v2241_v12, %v2216_v48  ;;  %v2760_v41 = vpack.c.bf16 %v2243_v45, %v2218_v61 }
 0x2bf   :  { %vm4982_vm4 = vmand %vm5565_vm2, %vm5564_vm8  ;;  %2768 = vmatpush1.bf16.msk.msra.mxu1 %vm2767_vm5, %v2766_v1  ;;  %v2271_v28 = vsel %vm2269_vm0, %v2264_v62, %v2266_v15  ;;  %vm5577_vm15 = vcmp.lt.s32.totalorder %v3245_v14, 14  ;;  %v2270_v14 = vsel %vm2269_vm0, %v2266_v15, %v2268_v13  ;;  %v2273_v20 = vsel %vm2269_vm0, %v2268_v13, %v2262_v32 }
 0x2c0   :  { %vm2245_vm1 = vmand %vm5569_vm3, %vm5568_vm9  ;;  %2759 = vmatprep.subr.msk.bf16.mxu0 %vm4973_vm12, %v2757_v17  ;;  %v2272_v18 = vsel %vm2269_vm0, %v2262_v32, %v2264_v62 }
 0x2c1   :  { %vm4995_vm11 = vmand %vm2160_vm10, %vm5570_vm6  ;;  %vm5580_vm6 = vcmp.lt.s32.totalorder %v3253_v19, 14  ;;  %v2588_v19 = vld [vmem:[%s5083_s3 + $0x20] sm:$0xff] }
 0x2c2   :  { %vm5573_vm5 = vmmov %vm5565_vm2 }
 0x2c3   :  { %vm5006_vm13 = vmpackc.low %vm4982_vm4, %vm5573_vm5 }
 0x2c4   :  { %vm5576_vm8 = vmmov %vm5569_vm3  ;;  %2771 = vmatprep.subr.msk.bf16.mxu1 %vm5006_vm13, %v2769_v43  ;;  %vm5578_vm3 = vcmp.lt.s32.totalorder %v3257_v21, 14  ;;  %vm5583_vm13 = vcmask 326656  }
 0x2c5   :  { %vm2761_vm2 = vmpackc.low %vm2245_vm1, %vm5576_vm8 }
 0x2c6   :  { %vm2773_vm4 = vmpackc.low %vm4995_vm11, %vm2160_vm10  ;;  %2762 = vmatpush1.bf16.msk.msra.mxu0 %vm2761_vm2, %v2760_v41 }
 0x2c7   :  { %vm2275_vm9 = vmand %vm2159_vm7, %vm5577_vm15  ;;  %2774 = vmatpush1.bf16.msk.msra.mxu1 %vm2773_vm4, %v2772_v6  ;;  %vm5582_vm7 = vcmp.lt.s32.totalorder %v3263_v25, 14 }
 0x2c8   :  { %vm5579_vm1 = vmmov %vm5573_vm5  ;;  %2597 = vmatprep.subr.msk.mxu0 %vm2275_vm9, %v2271_v28 }
 0x2c9   :  { %vm2277_vm14 = vmand %vm5579_vm1, %vm5578_vm3 }
 0x2ca   :  { %vm5581_vm11 = vmmov %vm5576_vm8  ;;  %2608 = vmatprep.subr.msk.mxu1 %vm2277_vm14, %v2273_v20 }
 0x2cb   :  { %vm2274_vm5 = vmand %vm5581_vm11, %vm5580_vm6 }
 0x2cc   :  { %vm2276_vm12 = vmand %vm2160_vm10, %vm5582_vm7  ;;  %2598 = vmatpush1.msk.msra.mxu0 %vm2274_vm5, %v2272_v18 }
 0x2cd   :  { %2609 = vmatpush1.msk.msra.mxu1 %vm2276_vm12, %v2270_v14  ;;  %2599 = vmatmul.mubr.msk.f32.vlgmr.msra.gmra.mrb[10].mxu0 %vm5583_vm13, %v2588_v19  ;;  %vm5584_vm8 = vmmov %vm5583_vm13 }
 0x2ce   :  { %2610 = vmatmul.mubr.msk.f32.vlgmr.msra.gmra.mrb[10].mxu1 %vm5584_vm8, %v2588_v19 }
 0x308   :  { %v1085_v21 = vpop.f32.mrb[8].mxu1 }
 0x309   :  { %v1096_v24 = vmax.f32 %v1085_v21, 0.0  ;;  %v1087_v25 = vpop.f32.mrb[9].mxu1 }
 0x30a   :  { %v1097_v31 = vmax.f32 %v1087_v25, 0.0 }
 0x30b   :  { %v1014_v55 = vpop.f32.mrb[8].mxu0  ;;  %1100 = vst [vmem:[%s5081_s4 + $0x30] sm:$0xff] %v1096_v24 }
 0x30c   :  { %v1094_v39 = vmax.f32 %v1014_v55, 0.0  ;;  %v1016_v5 = vpop.f32.mrb[9].mxu0  ;;  %1101 = vst [vmem:[%s5081_s4 + $0x38] sm:$0xff] %v1097_v31 }
 0x30d   :  { %v1095_v8 = vmax.f32 %v1016_v5, 0.0 }
 0x30e   :  { %1098 = vst [vmem:[%s5081_s4 + $0x20] sm:$0xff] %v1094_v39 }
 0x30f   :  { %1099 = vst [vmem:[%s5081_s4 + $0x28] sm:$0xff] %v1095_v8 }
 0x3a0   :  { %v2361_v56 = vpop.f32.mrb[10].mxu0 }
 0x3a1   :  { %v2432_v38 = vpop.f32.mrb[10].mxu1  ;;  %v2441_v10 = vmax.f32 %v2361_v56, 0.0  ;;  %v2363_v60 = vpop.f32.mrb[11].mxu0 }
 0x3a2   :  { %v2443_v7 = vmax.f32 %v2432_v38, 0.0  ;;  %v2434_v26 = vpop.f32.mrb[11].mxu1  ;;  %v2442_v33 = vmax.f32 %v2363_v60, 0.0 }
 0x3a3   :  { %v2444_v22 = vmax.f32 %v2434_v26, 0.0  ;;  %2445 = vst [vmem:[%s5081_s4 + $0x40] sm:$0xff] %v2441_v10 }
 0x3a4   :  { %2447 = vst [vmem:[%s5081_s4 + $0x50] sm:$0xff] %v2443_v7  ;;  %2446 = vst [vmem:[%s5081_s4 + $0x48] sm:$0xff] %v2442_v33 }
 0x3a5   :  { %2448 = vst [vmem:[%s5081_s4 + $0x58] sm:$0xff] %v2444_v22 }

</bundles_post_ra>
